<compile_context>
chip_gen: v7x
topology: tpu7x:2x2x1
jax: 0.10.0
libtpu: 0.0.40
codegen_flags: <defaults>
</compile_context>

<pallas_src>
import functools
import math

import numpy as np
import jax
import jax.numpy as jnp
from jax import lax
from jax.experimental import pallas as pl
from jax.experimental.pallas import tpu as pltpu


# -----------------------------------------------------------------------------
# Per-channel constants (hoisted out of the kernel).
#   channel c of a half:  sin(v * inv_dim_t[c] + phase[c])
#   inv_dim_t[c] = temperature ** (-2*floor(c/2)/F)
#   phase[c]     = 0 (even c -> sin) or pi/2 (odd c -> cos)
# -----------------------------------------------------------------------------
def _channel_consts(num_pos_feats, temperature):
    c = np.arange(num_pos_feats, dtype=np.float64)
    half = np.floor(c * 0.5)
    dim_t = np.float64(temperature) ** (2.0 * half / float(num_pos_feats))
    inv = (1.0 / dim_t).astype(np.float32).reshape(num_pos_feats, 1)
    phase = ((c - 2.0 * half) * (math.pi / 2.0)).astype(np.float32).reshape(
        num_pos_feats, 1)
    return jnp.asarray(inv), jnp.asarray(phase)


# -----------------------------------------------------------------------------
# Kernels
# -----------------------------------------------------------------------------
def _flat_encode_store(inv_ref, phase_ref, y_row, x_row, o_ref):
    """Build the full (2F, tile) argument, single sin, single full-block store."""
    f = inv_ref.shape[0]
    t = o_ref.shape[-1]
    inv_b = jnp.broadcast_to(inv_ref[...], (f, t))    # hoisted, reused by halves
    ph_b = jnp.broadcast_to(phase_ref[...], (f, t))
    arg_y = y_row * inv_b + ph_b                      # (1,t) x (f,t) -> (f,t)
    arg_x = x_row * inv_b + ph_b
    val = jnp.sin(jnp.concatenate([arg_y, arg_x], axis=0))   # (2f, t)
    o_ref[...] = val.astype(o_ref.dtype)


def _pos_kernel_iota_flat(inv_ref, phase_ref, o_ref, *, width, y_mul, x_mul):
    """Write-only kernel (mask=None): derive (h, w) from the flat spatial index."""
    t = o_ref.shape[-1]
    s0 = pl.program_id(1) * t
    s = (s0 + lax.broadcasted_iota(jnp.int32, (1, t), 1)).astype(jnp.float32)
    # h = s // width, exact for H*W <= 2**20 (guarded in the wrapper).
    h = jnp.floor((s + 0.5) * (1.0 / width))
    w = s - h * width
    y_row = (h + 1.0) * y_mul
    x_row = (w + 1.0) * x_mul
    _flat_encode_store(inv_ref, phase_ref, y_row, x_row, o_ref)


def _pos_kernel_embeds_flat(inv_ref, phase_ref, y_ref, x_ref, o_ref):
    """General path: (1, tile) embed rows streamed in, full sin expansion here."""
    _flat_encode_store(inv_ref, phase_ref, y_ref[...], x_ref[...], o_ref)


def _pos_kernel_tables(ty_ref, tx_ref, o_ref):
    """Separable path (mask=None, W%128==0): pure broadcast + store, no sin."""
    two_f, th, w = o_ref.shape
    f = two_f // 2
    y_full = jnp.broadcast_to(ty_ref[...], (f, th, w))   # lane broadcast
    x_full = jnp.broadcast_to(tx_ref[...], (f, th, w))   # sublane broadcast
    o_ref[...] = jnp.concatenate([y_full, x_full], axis=0).astype(o_ref.dtype)


# -----------------------------------------------------------------------------
# Tile selection (~4 MiB blocks: v7x-safe, big enough to amortise step overhead)
# -----------------------------------------------------------------------------
def _pick_spatial_tile(hw, channels, batch, itemsize, max_block_bytes=4 << 20):
    if hw < 256:
        return hw                                   # full-dim block (always legal)
    max_elems = max(128, max_block_bytes // (itemsize * channels))
    limit = min(hw, max_elems)
    if batch == 1:
        limit = min(limit, max(128, hw // 2))       # >= 2 grid steps (megacore)
    tile = (limit // 128) * 128
    t = tile
    while t > 128 and hw % t != 0:                  # prefer a tile dividing hw
        t -= 128
    if hw % t == 0:
        tile = t
    return tile


def _pick_row_tile(h, w, channels, batch, itemsize, max_block_bytes=4 << 20):
    if h <= 8:
        return h                                    # full-dim block
    max_rows = max(8, (max_block_bytes // (itemsize * channels * w)) // 8 * 8)
    th = min((h // 8) * 8, max_rows)
    if batch == 1 and h >= 16:
        th = min(th, max(8, (h // 2) // 8 * 8))     # >= 2 grid steps (megacore)
    t = th
    while t > 8 and h % t != 0:
        t -= 8
    if h % t == 0:
        th = t
    return max(th, 8)


# -----------------------------------------------------------------------------
# Public wrapper (matches PositionEmbeddingSine.forward)
# -----------------------------------------------------------------------------
def position_embedding_sine(x, mask=None, *, num_pos_feats=64, temperature=10000,
                            normalize=False, scale=None, out_dtype=jnp.float32):
    if scale is not None and normalize is False:
        raise ValueError("normalize should be True if scale is passed")
    if scale is None:
        scale = 2 * math.pi
    if num_pos_feats % 2 != 0:
        raise ValueError("num_pos_feats must be even for the sin/cos interleave")

    B, _, H, W = x.shape
    F = num_pos_feats
    HW = H * W
    eps = 1e-6
    dsize = jnp.dtype(out_dtype).itemsize
    cparams = pltpu.CompilerParams(dimension_semantics=("parallel", "parallel"))
    inv, phase = _channel_consts(F, temperature)            # (F, 1) f32 each
    const_spec = pl.BlockSpec((F, 1), lambda b, t: (0, 0))  # resident, DMA'd once

    if mask is None:
        y_mul = float(scale / (H + eps)) if normalize else 1.0
        x_mul = float(scale / (W + eps)) if normalize else 1.0

        if W % 128 == 0 and F % 8 == 0:
            # --- separable, store-bound path (lane-dense 4-D blocks) ---------
            th = _pick_row_tile(H, W, 2 * F, B, dsize)
            hs = (jnp.arange(H, dtype=jnp.float32) + 1.0) * y_mul
            ws = (jnp.arange(W, dtype=jnp.float32) + 1.0) * x_mul
            ty = jnp.sin(hs[None, :] * inv + phase)[:, :, None]   # (F, H, 1)
            tx = jnp.sin(ws[None, :] * inv + phase)[:, None, :]   # (F, 1, W)
            ce = pl.CostEstimate(
                flops=2 * B * 2 * F * HW, transcendentals=0,
                bytes_accessed=B * 2 * F * HW * dsize + 4 * F * (H + W))
            return pl.pallas_call(
                _pos_kernel_tables,
                out_shape=jax.ShapeDtypeStruct((B, 2 * F, H, W), out_dtype),
                grid=(B, pl.cdiv(H, th)),
                in_specs=[pl.BlockSpec((F, th, 1), lambda b, t: (0, t, 0)),
                          pl.BlockSpec((F, 1, W), lambda b, t: (0, 0, 0))],
                out_specs=pl.BlockSpec((None, 2 * F, th, W),
                                       lambda b, t: (b, 0, t, 0)),
                compiler_params=cparams, cost_estimate=ce,
            )(ty, tx)

        if HW <= (1 << 20):
            # --- flattened, write-only iota path (lane-dense for any W) ------
            tile = _pick_spatial_tile(HW, 2 * F, B, dsize)
            kernel = functools.partial(
                _pos_kernel_iota_flat, width=W, y_mul=y_mul, x_mul=x_mul)
            ce = pl.CostEstimate(
                flops=8 * B * 2 * F * HW, transcendentals=B * 2 * F * HW,
                bytes_accessed=B * 2 * F * HW * dsize + 8 * F)
            out = pl.pallas_call(
                kernel,
                out_shape=jax.ShapeDtypeStruct((B, 2 * F, HW), out_dtype),
                grid=(B, pl.cdiv(HW, tile)),
                in_specs=[const_spec, const_spec],
                out_specs=pl.BlockSpec((None, 2 * F, tile),
                                       lambda b, t: (b, 0, t)),
                compiler_params=cparams, cost_estimate=ce,
            )(inv, phase)
            return out.reshape(B, 2 * F, H, W)
        # very large HW: fall through to the general streamed-embeds path.

    # ---- general path: boolean mask (or huge-HW fallback) --------------------
    # TODO(synk): the boolean-mask cumsum (prefix sums along H and W) stays in
    # plain JAX; only the heavy per-element sin/cos expansion runs in the kernel.
    if mask is None:
        y_embed = jnp.broadcast_to(
            jnp.arange(1, H + 1, dtype=jnp.float32)[None, :, None], (B, H, W))
        x_embed = jnp.broadcast_to(
            jnp.arange(1, W + 1, dtype=jnp.float32)[None, None, :], (B, H, W))
    else:
        not_mask = jnp.logical_not(mask).astype(jnp.float32)
        y_embed = jnp.cumsum(not_mask, axis=1, dtype=jnp.float32)
        x_embed = jnp.cumsum(not_mask, axis=2, dtype=jnp.float32)
    if normalize:
        y_embed = y_embed / (y_embed[:, -1:, :] + eps) * scale
        x_embed = x_embed / (x_embed[:, :, -1:] + eps) * scale
    y_rows = y_embed.reshape(B, 1, HW)
    x_rows = x_embed.reshape(B, 1, HW)

    tile = _pick_spatial_tile(HW, 2 * F, B, dsize)
    row_spec = pl.BlockSpec((None, 1, tile), lambda b, t: (b, 0, t))
    ce = pl.CostEstimate(
        flops=6 * B * 2 * F * HW, transcendentals=B * 2 * F * HW,
        bytes_accessed=B * 2 * F * HW * dsize + 2 * B * HW * 4 + 8 * F)
    out = pl.pallas_call(
        _pos_kernel_embeds_flat,
        out_shape=jax.ShapeDtypeStruct((B, 2 * F, HW), out_dtype),
        grid=(B, pl.cdiv(HW, tile)),
        in_specs=[const_spec, const_spec, row_spec, row_spec],
        out_specs=pl.BlockSpec((None, 2 * F, tile), lambda b, t: (b, 0, t)),
        compiler_params=cparams, cost_estimate=ce,
    )(inv, phase, y_rows, x_rows)
    return out.reshape(B, 2 * F, H, W)


# -----------------------------------------------------------------------------
# Pure-JAX transcription of the PyTorch forward, for validation.
# -----------------------------------------------------------------------------
def _reference_position_embedding_sine(x, mask=None, *, num_pos_feats=64,
                                       temperature=10000, normalize=False,
                                       scale=None):
    if scale is None:
        scale = 2 * math.pi
    B, _, H, W = x.shape
    if mask is None:
        not_mask = jnp.ones((B, H, W), dtype=jnp.float32)
    else:
        not_mask = jnp.logical_not(mask).astype(jnp.float32)
    y_embed = jnp.cumsum(not_mask, axis=1, dtype=jnp.float32)
    x_embed = jnp.cumsum(not_mask, axis=2, dtype=jnp.float32)
    if normalize:
        eps = 1e-6
        y_embed = y_embed / (y_embed[:, -1:, :] + eps) * scale
        x_embed = x_embed / (x_embed[:, :, -1:] + eps) * scale
    F = num_pos_feats
    dim_t = jnp.arange(F, dtype=jnp.float32)
    dim_t = temperature ** (2 * jnp.floor(dim_t / 2) / F)
    pos_x = x_embed[:, :, :, None] / dim_t
    pos_y = y_embed[:, :, :, None] / dim_t
    pos_x = jnp.stack(
        (jnp.sin(pos_x[:, :, :, 0::2]), jnp.cos(pos_x[:, :, :, 1::2])),
        axis=4).reshape(B, H, W, F)
    pos_y = jnp.stack(
        (jnp.sin(pos_y[:, :, :, 0::2]), jnp.cos(pos_y[:, :, :, 1::2])),
        axis=4).reshape(B, H, W, F)
    pos = jnp.concatenate((pos_y, pos_x), axis=3)
    return jnp.transpose(pos, (0, 3, 1, 2))


if __name__ == "__main__":
    # Module has no learned parameters; num_pos_feats/temperature are config.
    B, C, H, W = 2, 4, 16, 16
    num_pos_feats = 16  # output channels = 2 * 16 = 32

    key = jax.random.PRNGKey(0)
    x = jax.random.normal(key, (B, C, H, W), dtype=jnp.float32)

    def _check(xx, mask, normalize):
        got = jax.block_until_ready(position_embedding_sine(
            xx, mask=mask, num_pos_feats=num_pos_feats, temperature=10000,
            normalize=normalize))
        ref = _reference_position_embedding_sine(
            xx, mask=mask, num_pos_feats=num_pos_feats, temperature=10000,
            normalize=normalize)
        assert got.shape == ref.shape, (got.shape, ref.shape)
        err = float(jnp.max(jnp.abs(got - ref)))
        assert jnp.allclose(got, ref, atol=1e-5, rtol=1e-5), err

    # 1) mask=None, no normalization  -> flattened write-only iota kernel.
    _check(x, mask=None, normalize=False)

    # 2) mask=None, normalized        -> flattened write-only iota kernel.
    _check(x, mask=None, normalize=True)

    # 3) boolean padding mask         -> cumsum glue + streamed-embeds kernel.
    hh = jnp.arange(H)[None, :, None]
    ww = jnp.arange(W)[None, None, :]
    mask = jnp.broadcast_to((hh >= 12) | (ww >= 13), (B, H, W))
    _check(x, mask=mask, normalize=True)

    # 4) lane-aligned width (W=128)   -> separable, store-bound table kernel.
    x_wide = jax.random.normal(jax.random.PRNGKey(0), (1, 3, 16, 128),
                               dtype=jnp.float32)
    _check(x_wide, mask=None, normalize=True)

    print("KERNEL_OK")
</pallas_src>

<mosaic_0001>
module attributes {stable_mosaic.version = 11 : i64} {
  func.func @_pos_kernel_iota_flat(%arg0: i32, %arg1: i32, %arg2: memref<16x1xf32, #tpu.memory_space<vmem>>, %arg3: memref<16x1xf32, #tpu.memory_space<vmem>>, %arg4: memref<1x32x256xf32, #tpu.memory_space<vmem>>) attributes {dimension_semantics = [#tpu.dimension_semantics<parallel>, #tpu.dimension_semantics<parallel>], iteration_bounds = array<i64: 2, 1>, scalar_prefetch = 0 : i64, scratch_operands = 0 : i64, tpu.core_type = #tpu.core_type<tc>, window_params = [{pipeline_mode = #tpu.pipeline_mode<synchronous>, transform_indices = @transform_0, window_bounds = array<i64: 16, 1>}, {pipeline_mode = #tpu.pipeline_mode<synchronous>, transform_indices = @transform_1, window_bounds = array<i64: 16, 1>}, {transform_indices = @transform_2, window_bounds = array<i64: 1, 32, 256>}]} {
    %c256_i32 = arith.constant 256 : i32
    %0 = arith.muli %arg1, %c256_i32 : i32
    %1 = tpu.iota {dimensions = array<i32: 1>} : vector<1x256xi32>
    %2 = vector.broadcast %0 : i32 to vector<1x256xi32>
    %3 = arith.addi %2, %1 : vector<1x256xi32>
    %4 = arith.sitofp %3 : vector<1x256xi32> to vector<1x256xf32>
    %cst = arith.constant 5.000000e-01 : f32
    %5 = vector.broadcast %cst : f32 to vector<1x256xf32>
    %6 = arith.addf %4, %5 : vector<1x256xf32>
    %cst_0 = arith.constant 6.250000e-02 : f32
    %7 = vector.broadcast %cst_0 : f32 to vector<1x256xf32>
    %8 = arith.mulf %6, %7 : vector<1x256xf32>
    %9 = math.floor %8 : vector<1x256xf32>
    %cst_1 = arith.constant 1.600000e+01 : f32
    %10 = vector.broadcast %cst_1 : f32 to vector<1x256xf32>
    %11 = arith.mulf %9, %10 : vector<1x256xf32>
    %12 = arith.subf %4, %11 : vector<1x256xf32>
    %cst_2 = arith.constant 1.000000e+00 : f32
    %13 = vector.broadcast %cst_2 : f32 to vector<1x256xf32>
    %14 = arith.addf %9, %13 : vector<1x256xf32>
    %cst_3 = arith.constant 1.000000e+00 : f32
    %15 = vector.broadcast %cst_3 : f32 to vector<1x256xf32>
    %16 = arith.mulf %14, %15 : vector<1x256xf32>
    %cst_4 = arith.constant 1.000000e+00 : f32
    %17 = vector.broadcast %cst_4 : f32 to vector<1x256xf32>
    %18 = arith.addf %12, %17 : vector<1x256xf32>
    %cst_5 = arith.constant 1.000000e+00 : f32
    %19 = vector.broadcast %cst_5 : f32 to vector<1x256xf32>
    %20 = arith.mulf %18, %19 : vector<1x256xf32>
    %c0 = arith.constant 0 : index
    %c0_6 = arith.constant 0 : index
    %21 = vector.load %arg2[%c0, %c0_6] : memref<16x1xf32, #tpu.memory_space<vmem>>, vector<16x1xf32>
    %22 = vector.shape_cast %21 : vector<16x1xf32> to vector<16x1xf32>
    %23 = vector.broadcast %22 : vector<16x1xf32> to vector<16x256xf32>
    %c0_7 = arith.constant 0 : index
    %c0_8 = arith.constant 0 : index
    %24 = vector.load %arg3[%c0_7, %c0_8] : memref<16x1xf32, #tpu.memory_space<vmem>>, vector<16x1xf32>
    %25 = vector.shape_cast %24 : vector<16x1xf32> to vector<16x1xf32>
    %26 = vector.broadcast %25 : vector<16x1xf32> to vector<16x256xf32>
    %27 = vector.broadcast %16 : vector<1x256xf32> to vector<16x256xf32>
    %28 = arith.mulf %27, %23 : vector<16x256xf32>
    %29 = arith.addf %28, %26 : vector<16x256xf32>
    %30 = vector.broadcast %20 : vector<1x256xf32> to vector<16x256xf32>
    %31 = arith.mulf %30, %23 : vector<16x256xf32>
    %32 = arith.addf %31, %26 : vector<16x256xf32>
    %33 = tpu.concatenate %29, %32 in 0 : vector<16x256xf32>, vector<16x256xf32> -> vector<32x256xf32>
    %34 = math.sin %33 : vector<32x256xf32>
    %c0_9 = arith.constant 0 : index
    %c0_10 = arith.constant 0 : index
    %c0_11 = arith.constant 0 : index
    %35 = vector.load %arg4[%c0_9, %c0_10, %c0_11] : memref<1x32x256xf32, #tpu.memory_space<vmem>>, vector<1x32x256xf32>
    %36 = vector.shape_cast %35 : vector<1x32x256xf32> to vector<32x256xf32>
    %37 = vector.shape_cast %34 : vector<32x256xf32> to vector<1x32x256xf32>
    tpu.vector_store %arg4[%c0_9, %c0_10, %c0_11], %37 {strides = array<i32>} : memref<1x32x256xf32, #tpu.memory_space<vmem>>, vector<1x32x256xf32>,
    return
  }
  func.func @transform_0(%arg0: i32, %arg1: i32) -> (i32, i32) {
    %c0_i32 = arith.constant 0 : i32
    %c0_i32_0 = arith.constant 0 : i32
    %c0_i32_1 = arith.constant 0 : i32
    return %c0_i32, %c0_i32_0 : i32, i32
  }
  func.func @transform_1(%arg0: i32, %arg1: i32) -> (i32, i32) {
    %c0_i32 = arith.constant 0 : i32
    %c0_i32_0 = arith.constant 0 : i32
    %c0_i32_1 = arith.constant 0 : i32
    return %c0_i32, %c0_i32_0 : i32, i32
  }
  func.func @transform_2(%arg0: i32, %arg1: i32) -> (i32, i32, i32) {
    %c0_i32 = arith.constant 0 : i32
    %c0_i32_0 = arith.constant 0 : i32
    return %arg0, %c0_i32, %arg1 : i32, i32, i32
  }
}

</mosaic_0001>

<bundles_post_ra>
// kernel: tpu_custom_call.1
= control target key start
LH: loop header
LB: loop body
LE: loop exit
PB: predicated region body
PF: predicated region fallthrough
CT: control target
= control target key end

     0   :  { %7 = vsyncpa [#allocation3], 0  ;;  %s2162_s0 = inlined_call_operand.vmem [shape: f32[16,1], index: 0, kind: input, shape index: {}]   ;;  %s2163_s1 = inlined_call_operand.vmem [shape: f32[16,1], index: 1, kind: input, shape index: {}]   ;;  %s2164_s2 = inlined_call_operand.hbm [shape: f32[2,32,256], index: 2, kind: output, shape index: {}]  }
   0x1   :  { %9 = vsyncpa [#allocation3 + $0x1], 0  ;;  %s1395_s9 = smov 0   ;;  %s1397_s10 = smov 0  }
   0x2   :  { %s1399_s11 = smov 0   ;;  %s1401_s12 = smov 0  }
   0x3   :  { %s1403_s13 = smov 0   ;;  %s1405_s14 = smov 0  }
   0x4 LB: > { %s1117_s15 = sadd.s32 4294967295, %s1368_s14   ;;  %s1118_s16 = sadd.s32 4294967294, %s1368_s14   ;;  %s1368_s14 = sphi %s1405_s14, %s15_s14   ;;  %s1364_s13 = sphi %s1403_s13, %s2183_s13   ;;  %s1360_s12 = sphi %s1401_s12, %s2182_s12   ;;  %s1356_s11 = sphi %s1399_s11, %s2181_s11   ;;  %s1352_s10 = sphi %s1397_s10, %s2180_s10   ;;  %s1348_s9 = sphi %s1395_s9, %s2179_s9  }
   0x5   : > { %s27_s17 = sadd.s32 1, %s1364_s13  ;;  %s78_s18 = sadd.s32 1, %s1356_s11 }
   0x6   : > { %p29_p0 = scmp.ge.s32.totalorder %s27_s17, 2  ;;  %p88_p1 = scmp.ne.s32.totalorder %s1356_s11, %s1352_s10 }
   0x7   : > { %p89_p2 = scmp.eq.s32.totalorder %s1117_s15, 1  ;;  %p94_p3 = scmp.ne.s32.totalorder %s1352_s10, %s1348_s9 }
   0x8   : > { %s2185_s17 = smov (%p29_p0, %s27_s17), 0  ;;  %p95_p5 = scmp.eq.s32.totalorder %s1118_s16, 1 }
   0x9   : > { %p1435_p4 = por %p89_p2, %p88_p1  ;;  %s73_s20 = ssub.s32 %s1364_s13, %s2185_s17 }
   0xa   : > { %p1120_p6 = scmp.ge.s32.totalorder %s1368_s14, 1  ;;  %p76_p7 = scmp.eq.s32.totalorder %s73_s20, 0 }
   0xb   : > { %p1442_p8 = por %p95_p5, %p94_p3  ;;  %p119_p9 = scmp.lt.s32.totalorder %s1368_s14, 3 }
   0xc   : > { %s1448_s22 = scalar_select %p76_p7, %s1356_s11, %s78_s18  }
   0xd   : > { %p120_p10 = pnand %p1120_p6, %p119_p9 }
   0xe   : > { %v172_v0 = vld [vmem:[%s2163_s1] sm:$0xff] (!%p120_p10)  ;;  %v138_v2 = vlaneseq (!%p120_p10)  ;;  %v1370_v3 = vmov (!%p120_p10), 0   ;;  %v173_v5 = vld [vmem:[%s2163_s1 + $0x8] sm:$0xff] (!%p120_p10)  ;;  %s133_s3 = sand.u32 (!%p120_p10), 1, %s1352_s10   ;;  %s1159_s6 = sshll.u32 (!%p120_p10), %s1360_s12, 10 }
   0xf   : > { %123 = sbr.rel (%p120_p10) target bundleno = 397 (0x18d), region = 28  ;;  %v160_v1 = vld [vmem:[%s2162_s0] sm:$0xff] (!%p120_p10)  ;;  %1257 = vset.pattern.permute.xlu1 (!%p120_p10), %v1370_v3  ;;  %1256 = vset.pattern.permute.xlu0 (!%p120_p10), %v1370_v3  ;;  %v161_v6 = vld [vmem:[%s2162_s0 + $0x8] sm:$0xff] (!%p120_p10)  ;;  %s1121_s4 = sshll.u32 (!%p120_p10), %s133_s3, 6 }
  0x10   : > { %176 = vperm.xlu1 (!%p120_p10), %1257, %v172_v0   ;;  %164 = vperm.xlu0 (!%p120_p10), %1256, %v160_v1   ;;  %v139_v4 = vand.u32 (!%p120_p10), 127, %v138_v2  ;;  %s1749_s5 = scalar_lea.vmem (!%p120_p10), [#allocation2], %s1121_s4  ;;  %s2108_s16 = scalar_lea.hbm (!%p120_p10), %s2164_s2, %s1159_s6 }
  0x11   : > { %s1056_s7 = sshll.u32 (!%p120_p10), %s1749_s5, 4  ;;  %s2116_s12 = scalar_lea.sflag (!%p120_p10), [#allocation3], %s133_s3  ;;  %s2110_s7 = int_to_ptr.vmem [resolvable:$true] %s1056_s7 }
  0x12   : > { %v140_v7 = vadd.s32 (!%p120_p10), 128, %v139_v4  ;;  %v144_v8 = vcvt.s32.f32 (!%p120_p10), %v139_v4  ;;  %v1371_v4 = vmov (!%p120_p10), 683565275   ;;  %s1290_s18 = scalar_lea.vmem (!%p120_p10), %s2110_s7, 1024  ;;  %s1377_s20 = smov (!%p120_p10), [#allocation2]  }
  0x13   : > { %p1291_p11 = scmp.ne.s32.totalorder (!%p120_p10), %s2110_s7, %s1290_s18  ;;  %s1294_s23 = sshll.u32 (!%p120_p10), %s1377_s20, 4  ;;  %s1295_s23 = int_to_ptr.vmem [resolvable:$false] %s1294_s23 }
  0x14   : > { %181 = vperm.xlu1 (!%p120_p10), %1257, %v173_v5   ;;  %169 = vperm.xlu0 (!%p120_p10), %1256, %v161_v6   ;;  %v145_v9 = vcvt.s32.f32 (!%p120_p10), %v140_v7  ;;  %v146_v10 = vadd.f32 (!%p120_p10), 0.5, %v144_v8  ;;  %v1372_v6 = vmov (!%p120_p10), 2475754826   ;;  %s1296_s24 = scalar_lea.vmem (!%p120_p10), %s1295_s23, 2048  ;;  %p1297_p0 = scmp.lt.s32.totalorder (!%p120_p10), %s2110_s7, %s1295_s23 }
  0x15   : > { %p1292_p12 = pnand (!%p120_p10), %p1291_p11, %p1435_p4  ;;  %p1298_p1 = scmp.lt.s32.totalorder (!%p120_p10), %s1296_s24, %s1290_s18 }
  0x16   : > { %v147_v11 = vadd.f32 0.5, %v145_v9  ;;  %v148_v12 = vmul.f32 0.0625, %v146_v10  ;;  %v1374_v10 = vmov 2102212464  }
  0x17   : > { %p1293_p13 = pneg %p1292_p12  ;;  %p1299_p2 = por %p1298_p1, %p1297_p0 }
  0x18   : > { %v149_v13 = vmul.f32 0.0625, %v147_v11  ;;  %v150_v14 = vfloor.f32 %v148_v12  ;;  %v1375_v12 = vmov 920167782  }
  0x19   : > { %p1300_p3 = pnand %p1299_p2, %p1293_p13 }
  0x1a   : > { %v151_v15 = vfloor.f32 %v149_v13  ;;  %v152_v16 = vmul.f32 16.0, %v150_v14  ;;  %v156_v20 = vadd.f32 1.0, %v150_v14 }
  0x1c   : > { %v153_v17 = vmul.f32 16.0, %v151_v15  ;;  %v154_v18 = vsub.f32 %v144_v8, %v152_v16  ;;  %v157_v21 = vadd.f32 1.0, %v151_v15  ;;  %v1373_v8 = vmov 2131351028  }
  0x1e   : > { %v155_v19 = vsub.f32 %v145_v9, %v153_v17  ;;  %v158_v22 = vadd.f32 1.0, %v154_v18 }
  0x20   : > { %v159_v23 = vadd.f32 1.0, %v155_v19  ;;  %v1376_v19 = vmov 1326507024  }
  0x8f   : > { %v177_v24 = vpop.permute.xlu1 %176  ;;  %v165_v25 = vpop.permute.xlu0 %164 }
  0x90   : > { %v184_v26 = vmul.f32 %v165_v25, %v156_v20  ;;  %v185_v27 = vmul.f32 %v165_v25, %v157_v21  ;;  %v192_v28 = vmul.f32 %v165_v25, %v158_v22  ;;  %v193_v29 = vmul.f32 %v165_v25, %v159_v23 }
  0x92   : > { %v1462_v30 = vadd.f32 %v184_v26, %v177_v24  ;;  %v1464_v31 = vadd.f32 %v192_v28, %v177_v24  ;;  %v1466_v32 = vadd.f32 %v193_v29, %v177_v24  ;;  %v1468_v35 = vadd.f32 %v185_v27, %v177_v24 }
  0x93   : > { %v170_v33 = vpop.permute.xlu0 %169  ;;  %v182_v38 = vpop.permute.xlu1 %181 }
  0x94   : > { %v186_v34 = vmul.f32 %v170_v33, %v156_v20  ;;  %v194_v36 = vmul.f32 %v170_v33, %v158_v22  ;;  %v195_v37 = vmul.f32 %v170_v33, %v159_v23  ;;  %v200_v39 = vand.u32 2147483647, %v1462_v30 }
  0x95   : > { %v203_v40 = vand.u32 2139095040, %v1462_v30  ;;  %v304_v46 = vand.u32 2147483647, %v1468_v35  ;;  %v307_v47 = vand.u32 2139095040, %v1468_v35  ;;  %v187_v52 = vmul.f32 %v170_v33, %v157_v21 }
  0x96   : > { %v1472_v41 = vadd.f32 %v186_v34, %v182_v38  ;;  %v1474_v42 = vadd.f32 %v194_v36, %v182_v38  ;;  %v1476_v43 = vadd.f32 %v195_v37, %v182_v38  ;;  %v207_v45 = vand.u32 8388607, %v200_v39 }
  0x97   : > { %v204_v44 = vshrl.u32 %v203_v40, 23  ;;  %v308_v50 = vshrl.u32 %v307_v47, 23  ;;  %v311_v51 = vand.u32 8388607, %v304_v46  ;;  %v1485_v60 = vadd.f32 %v187_v52, %v182_v38 }
  0x98   : > { %v411_v49 = vand.u32 2139095040, %v1472_v41  ;;  %v208_v54 = vor.u32 8388608, %v207_v45  ;;  %v408_v1 = vand.u32 2147483647, %v1472_v41  ;;  %vm1561_vm13 = vcmp.le.f32.partialorder %v200_v39, 0.7853982 }
  0x99   : > { %v1122_v48 = vadd.s32 4294967169, %v204_v44  ;;  %v1126_v55 = vadd.s32 4294967169, %v308_v50  ;;  %v312_v56 = vor.u32 8388608, %v311_v51  ;;  %vm202_vm14 = vcmp.lt.s32.totalorder %v1462_v30, 0 }
  0x9a   : > { %v412_v57 = vshrl.u32 %v411_v49, 23  ;;  %v1487_v63 = vshll.u32 %v208_v54, 8 }
  0x9b   : > { %v210_v53 = vadd.s32 1, %v1122_v48  ;;  %v314_v59 = vadd.s32 1, %v1126_v55  ;;  %v1489_v0 = vshll.u32 %v312_v56, 8 }
  0x9c   : > { %v1130_v2 = vadd.s32 4294967169, %v412_v57 }
  0x9d   : > { %vm211_vm0 = vcmp.gt.s32.totalorder %v210_v53, 0  ;;  %vm315_vm1 = vcmp.gt.s32.totalorder %v314_v59, 0 }
  0x9e   : > { %v212_v58 = vsel %vm211_vm0, %v210_v53, 0  ;;  %v316_v24 = vsel %vm315_vm1, %v314_v59, 0  ;;  %v418_v48 = vadd.s32 1, %v1130_v2  ;;  %vm306_vm1 = vcmp.lt.s32.totalorder %v1468_v35, 0 }
  0x9f   : > { %v213_v61 = vshrl.u32 %v212_v58, 5  ;;  %v214_v62 = vand.u32 31, %v212_v58  ;;  %v318_v27 = vand.u32 31, %v316_v24  ;;  %v317_v51 = vshrl.u32 %v316_v24, 5 }
  0xa0   : > { %vm419_vm11 = vcmp.gt.s32.totalorder %v418_v48, 0 }
  0xa1   : > { %v215_v3 = vsub.s32 32, %v214_v62  ;;  %v217_v5 = vshll.u32 %v1371_v4, %v214_v62  ;;  %v220_v7 = vshll.u32 %v1372_v6, %v214_v62  ;;  %v223_v9 = vshll.u32 %v1373_v8, %v214_v62 }
  0xa2   : > { %v226_v11 = vshll.u32 %v1374_v10, %v214_v62  ;;  %v229_v13 = vshll.u32 %v1375_v12, %v214_v62  ;;  %vm232_vm2 = vcmp.lt.s32.totalorder %v213_v61, 1  ;;  %vm233_vm3 = vcmp.lt.s32.totalorder %v213_v61, 2 }
  0xa3   : > { %v218_v14 = vshrl.u32 %v1372_v6, %v215_v3  ;;  %v221_v15 = vshrl.u32 %v1373_v8, %v215_v3  ;;  %v224_v16 = vshrl.u32 %v1374_v10, %v215_v3  ;;  %v216_v17 = vshrl.u32 %v1371_v4, %v215_v3 }
  0xa4   : > { %v227_v18 = vshrl.u32 %v1375_v12, %v215_v3  ;;  %v230_v20 = vshrl.u32 %v1376_v19, %v215_v3  ;;  %vm234_vm4 = vcmp.lt.s32.totalorder %v213_v61, 3  ;;  %vm235_vm5 = vcmp.lt.s32.totalorder %v213_v61, 4 }
  0xa5   : > { %v219_v21 = vor.u32 %v218_v14, %v217_v5  ;;  %v222_v22 = vor.u32 %v221_v15, %v220_v7  ;;  %v225_v23 = vor.u32 %v224_v16, %v223_v9  ;;  %v319_v40 = vsub.s32 32, %v318_v27 }
  0xa6   : > { %v228_v25 = vor.u32 %v227_v18, %v226_v11  ;;  %v231_v26 = vor.u32 %v230_v20, %v229_v13  ;;  %v321_v52 = vshll.u32 %v1371_v4, %v318_v27  ;;  %v324_v59 = vshll.u32 %v1372_v6, %v318_v27 }
  0xa7   : > { %v236_v28 = vsel %vm232_vm2, %v216_v17, %v219_v21  ;;  %v237_v29 = vsel %vm235_vm5, %v225_v23, 2102212464  ;;  %v240_v33 = vsel %vm232_vm2, %v219_v21, %v222_v22  ;;  %v244_v34 = vsel %vm232_vm2, %v222_v22, %v225_v23 }
  0xa8   : > { %v238_v36 = vsel %vm234_vm4, %v222_v22, %v237_v29  ;;  %v241_v37 = vsel %vm235_vm5, %v228_v25, 920167782  ;;  %v245_v38 = vsel %vm235_vm5, %v231_v26, 1326507024  ;;  %v322_v58 = vshrl.u32 %v1372_v6, %v319_v40 }
  0xa9   : > { %v239_v44 = vsel %vm233_vm3, %v236_v28, %v238_v36  ;;  %v242_v45 = vsel %vm234_vm4, %v225_v23, %v241_v37  ;;  %v246_v47 = vsel %vm234_vm4, %v228_v25, %v245_v38  ;;  %v325_v61 = vshrl.u32 %v1373_v8, %v319_v40 }
  0xaa   : > { %v243_v49 = vsel %vm233_vm3, %v240_v33, %v242_v45  ;;  %v247_v50 = vsel %vm233_vm3, %v244_v34, %v246_v47  ;;  %v255_v57 = vmul.u32 %v1487_v63, %v239_v44  ;;  %v327_v62 = vshll.u32 %v1373_v8, %v318_v27 }
  0xab   : > { %v1515_v53 = vmul.u32.u64.low %v1487_v63, %v247_v50  ;;  %v1516_v54 = vmul.u32.u64.high %v1487_v63, %v247_v50, %v1515_v53  ;;  %v1519_v55 = vmul.u32.u64.low %v1487_v63, %v243_v49  ;;  %v1520_v56 = vmul.u32.u64.high %v1487_v63, %v243_v49, %v1519_v55 }
  0xac   : > { %v328_v2 = vshrl.u32 %v1374_v10, %v319_v40  ;;  %v330_v3 = vshll.u32 %v1374_v10, %v318_v27  ;;  %v331_v5 = vshrl.u32 %v1375_v12, %v319_v40  ;;  %v323_v7 = vor.u32 %v322_v58, %v321_v52 }
  0xad   : > { %v326_v9 = vor.u32 %v325_v61, %v324_v59  ;;  %v333_v11 = vshll.u32 %v1375_v12, %v318_v27  ;;  %v334_v63 = vshrl.u32 %v1376_v19, %v319_v40  ;;  %vm257_vm6 = vc.u32 %v1516_v54, %v1519_v55 }
  0xae   : > { %v258_v13 = vadd.s32 1, %v1520_v56  ;;  %v320_v14 = vshrl.u32 %v1371_v4, %v319_v40  ;;  %v329_v15 = vor.u32 %v328_v2, %v327_v62  ;;  %v332_v16 = vor.u32 %v331_v5, %v330_v3 }
  0xaf   : > { %v335_v17 = vor.u32 %v334_v63, %v333_v11  ;;  %vm336_vm7 = vcmp.lt.s32.totalorder %v317_v51, 1  ;;  %vm337_vm8 = vcmp.lt.s32.totalorder %v317_v51, 2  ;;  %vm338_vm9 = vcmp.lt.s32.totalorder %v317_v51, 3 }
  0xb0   : > { %v259_v18 = vsel %vm257_vm6, %v258_v13, %v1520_v56  ;;  %vm339_vm10 = vcmp.lt.s32.totalorder %v317_v51, 4  ;;  %v344_v20 = vsel %vm336_vm7, %v323_v7, %v326_v9  ;;  %v348_v24 = vsel %vm336_vm7, %v326_v9, %v329_v15 }
  0xb1   : > { %v260_v21 = vadd.s32 %v259_v18, %v255_v57  ;;  %v341_v22 = vsel %vm339_vm10, %v329_v15, 2102212464  ;;  %v345_v23 = vsel %vm339_vm10, %v332_v16, 920167782  ;;  %v340_v25 = vsel %vm336_vm7, %v320_v14, %v323_v7 }
  0xb2   : > { %v346_v26 = vsel %vm338_vm9, %v329_v15, %v345_v23  ;;  %v349_v27 = vsel %vm339_vm10, %v335_v17, 1326507024  ;;  %v342_v29 = vsel %vm338_vm9, %v326_v9, %v341_v22  ;;  %v415_v40 = vand.u32 8388607, %v408_v1 }
  0xb3   : > { %v261_v28 = vadd.s32 536870912, %v260_v21  ;;  %v347_v33 = vsel %vm337_vm8, %v344_v20, %v346_v26  ;;  %v350_v34 = vsel %vm338_vm9, %v332_v16, %v349_v27  ;;  %v420_v49 = vsel %vm419_vm11, %v418_v48, 0 }
  0xb4   : > { %v351_v36 = vsel %vm337_vm8, %v348_v24, %v350_v34  ;;  %v1541_v37 = vmul.u32.u64.low %v1489_v0, %v347_v33  ;;  %v1542_v38 = vmul.u32.u64.high %v1489_v0, %v347_v33, %v1541_v37  ;;  %v343_v50 = vsel %vm337_vm8, %v340_v25, %v342_v29 }
  0xb5   : > { %v262_v44 = vshrl.u32 %v261_v28, 30  ;;  %v1548_v45 = vmul.u32.u64.low %v1489_v0, %v351_v36  ;;  %v1549_v47 = vmul.u32.u64.high %v1489_v0, %v351_v36, %v1548_v45  ;;  %v422_v52 = vand.u32 31, %v420_v49 }
  0xb6   : > { %v362_v56 = vadd.s32 1, %v1542_v38  ;;  %v416_v57 = vor.u32 8388608, %v415_v40  ;;  %v515_v58 = vand.u32 2139095040, %v1485_v60  ;;  %v359_v61 = vmul.u32 %v1489_v0, %v343_v50 }
  0xb7   : > { %v263_v53 = vshll.u32 %v262_v44, 30  ;;  %vm361_vm12 = vc.u32 %v1549_v47, %v1541_v37  ;;  %v423_v62 = vsub.s32 32, %v422_v52  ;;  %v286_v3 = vsub.s32 4, %v262_v44 }
  0xb8   : > { %v363_v51 = vsel %vm361_vm12, %v362_v56, %v1542_v38  ;;  %v512_v0 = vand.u32 2147483647, %v1485_v60  ;;  %v256_v7 = vadd.s32 %v1519_v55, %v1516_v54  ;;  %v1571_v9 = vshrl.u32 %v420_v49, 5 }
  0xb9   : > { %v1554_v59 = vsub.s32 %v260_v21, %v263_v53  ;;  %v364_v5 = vadd.s32 %v363_v51, %v359_v61  ;;  %v1573_v11 = vshll.u32 %v416_v57, 8  ;;  %v516_v39 = vshrl.u32 %v515_v58, 23 }
  0xba   : > { %v426_v14 = vshrl.u32 %v1372_v6, %v423_v62  ;;  %v429_v15 = vshrl.u32 %v1373_v8, %v423_v62  ;;  %v425_v16 = vshll.u32 %v1371_v4, %v422_v52  ;;  %v432_v17 = vshrl.u32 %v1374_v10, %v423_v62 }
  0xbb   : > { %v266_v2 = vsub.s32 0, %v1554_v59  ;;  %v365_v13 = vadd.s32 536870912, %v364_v5  ;;  %v434_v18 = vshll.u32 %v1374_v10, %v422_v52  ;;  %v435_v54 = vshrl.u32 %v1375_v12, %v423_v62 }
  0xbc   : > { %v287_v20 = vsel %vm202_vm14, %v286_v3, %v262_v44  ;;  %v428_v21 = vshll.u32 %v1372_v6, %v422_v52  ;;  %v438_v22 = vshrl.u32 %v1376_v19, %v423_v62  ;;  %v431_v24 = vshll.u32 %v1373_v8, %v422_v52 }
  0xbd   : > { %v1123_v63 = vmin.u32 %v266_v2, %v1554_v59  ;;  %v366_v23 = vshrl.u32 %v365_v13, 30  ;;  %v436_v25 = vor.u32 %v435_v54, %v434_v18  ;;  %v1134_v26 = vadd.s32 4294967169, %v516_v39 }
  0xbe   : > { %v427_v28 = vor.u32 %v426_v14, %v425_v16  ;;  %v430_v29 = vor.u32 %v429_v15, %v428_v21  ;;  %v437_v33 = vshll.u32 %v1375_v12, %v422_v52  ;;  %v289_v34 = vsel %vm1561_vm13, 0, %v287_v20 }
  0xbf   : > { %v268_v55 = vclz %v1123_v63  ;;  %v367_v36 = vshll.u32 %v366_v23, 30  ;;  %v433_v38 = vor.u32 %v432_v17, %v431_v24  ;;  %vm443_vm15 = vcmp.lt.s32.totalorder %v1571_v9, 4 }
  0xc0   : > { %v424_v40 = vshrl.u32 %v1371_v4, %v423_v62  ;;  %v439_v44 = vor.u32 %v438_v22, %v437_v33  ;;  %v449_v45 = vsel %vm443_vm15, %v436_v25, 920167782  ;;  %vm440_vm2 = vcmp.lt.s32.totalorder %v1571_v9, 1 }
  0xc1   : > { %v1124_v27 = vadd.s32 4294967294, %v268_v55  ;;  %v1595_v50 = vsub.s32 %v364_v5, %v367_v36  ;;  %vm441_vm3 = vcmp.lt.s32.totalorder %v1571_v9, 2  ;;  %vm442_vm4 = vcmp.lt.s32.totalorder %v1571_v9, 3 }
  0xc2   : > { %v448_v56 = vsel %vm440_vm2, %v427_v28, %v430_v29  ;;  %v390_v58 = vsub.s32 4, %v366_v23  ;;  %v450_v61 = vsel %vm442_vm4, %v433_v38, %v449_v45  ;;  %v452_v62 = vsel %vm440_vm2, %v430_v29, %v433_v38 }
  0xc3   : > { %vm1125_vm0 = vcmp.lt.s32.totalorder %v1124_v27, 0  ;;  %v370_v57 = vsub.s32 0, %v1595_v50  ;;  %vm1610_vm5 = vcmp.le.f32.partialorder %v304_v46, 0.7853982  ;;  %v453_v39 = vsel %vm443_vm15, %v439_v44, 1326507024 }
  0xc4   : > { %v271_v49 = vsel %vm1125_vm0, 0, %v1124_v27  ;;  %v445_v13 = vsel %vm443_vm15, %v433_v38, 2102212464  ;;  %v451_v14 = vsel %vm441_vm3, %v448_v56, %v450_v61  ;;  %v522_v16 = vadd.s32 1, %v1134_v26 }
  0xc5   : > { %v272_v52 = vsub.s32 32, %v271_v49  ;;  %v276_v53 = vsub.s32 4294967266, %v271_v49  ;;  %v273_v51 = vshll.u32 %v1554_v59, %v271_v49  ;;  %v1127_v63 = vmin.u32 %v370_v57, %v1595_v50 }
  0xc6   : > { %v454_v59 = vsel %vm442_vm4, %v436_v25, %v453_v39  ;;  %v293_v17 = vadd.s32 3, %v289_v34  ;;  %v444_v54 = vsel %vm440_vm2, %v424_v40, %v427_v28  ;;  %v1629_v55 = vand.u32 8388607, %v512_v0 }
  0xc7   : > { %v274_v2 = vshrl.u32 %v256_v7, %v272_v52  ;;  %v277_v3 = vadd.s32 127, %v276_v53  ;;  %v455_v46 = vsel %vm441_vm3, %v452_v62, %v454_v59  ;;  %v372_v18 = vclz %v1127_v63 }
  0xc8   : > { %v446_v21 = vsel %vm442_vm4, %v430_v29, %v445_v13  ;;  %v1634_v22 = vmul.u32.u64.low %v1573_v11, %v455_v46  ;;  %v1635_v24 = vmul.u32.u64.high %v1573_v11, %v455_v46, %v1634_v22  ;;  %vm523_vm6 = vcmp.gt.s32.totalorder %v522_v16, 0 }
  0xc9   : > { %v275_v7 = vor.u32 %v274_v2, %v273_v51  ;;  %v278_v15 = vshll.u32 %v277_v3, 23  ;;  %v1128_v25 = vadd.s32 4294967294, %v372_v18  ;;  %v391_v34 = vsel %vm306_vm1, %v390_v58, %v366_v23 }
  0xca   : > { %v1638_v26 = vmul.u32.u64.low %v1573_v11, %v451_v14  ;;  %v1639_v27 = vmul.u32.u64.high %v1573_v11, %v451_v14, %v1638_v26  ;;  %v524_v36 = vsel %vm523_vm6, %v522_v16, 0  ;;  %v447_v29 = vsel %vm441_vm3, %v444_v54, %v446_v21 }
  0xcb   : > { %v279_v20 = vor.u32 4788187, %v278_v15  ;;  %v282_v33 = vcvt.s32.f32 %v275_v7  ;;  %vm1129_vm7 = vcmp.lt.s32.totalorder %v1128_v25, 0  ;;  %v520_v38 = vor.u32 8388608, %v1629_v55 }
  0xcc   : > { %v526_v40 = vand.u32 31, %v524_v36  ;;  %v360_v45 = vadd.s32 %v1541_v37, %v1549_v47  ;;  %v375_v49 = vsel %vm1129_vm7, 0, %v1128_v25  ;;  %vm465_vm8 = vc.u32 %v1635_v24, %v1638_v26 }
  0xcd   : > { %v280_v28 = vand.u32 2147483647, %v279_v20  ;;  %v376_v52 = vsub.s32 32, %v375_v49  ;;  %v380_v53 = vsub.s32 4294967266, %v375_v49  ;;  %v393_v23 = vsel %vm1610_vm5, 0, %v391_v34 }
  0xce   : > { %v466_v56 = vadd.s32 1, %v1639_v27  ;;  %v1654_v57 = vand.u32 3, %v293_v17  ;;  %v463_v58 = vmul.u32 %v1573_v11, %v447_v29  ;;  %v527_v61 = vsub.s32 32, %v526_v40 }
  0xcf   : > { %v283_v44 = vmul.f32 %v282_v33, %v280_v28  ;;  %v377_v62 = vshll.u32 %v1595_v50, %v375_v49  ;;  %v378_v37 = vshrl.u32 %v360_v45, %v376_v52  ;;  %v381_v47 = vadd.s32 127, %v380_v53 }
  0xd0   : > { %v467_v51 = vsel %vm465_vm8, %v466_v56, %v1639_v27  ;;  %v397_v3 = vadd.s32 3, %v393_v23  ;;  %v1661_v63 = vshrl.u32 %v524_v36, 5  ;;  %v529_v59 = vshll.u32 %v1371_v4, %v526_v40 }
  0xd1   : > { %v284_v9 = vxor.u32 2147483648, %v283_v44  ;;  %v468_v39 = vadd.s32 %v467_v51, %v463_v58  ;;  %v379_v14 = vor.u32 %v378_v37, %v377_v62  ;;  %v382_v11 = vshll.u32 %v381_v47, 23 }
  0xd2   : > { %v530_v7 = vshrl.u32 %v1372_v6, %v527_v61  ;;  %v532_v15 = vshll.u32 %v1372_v6, %v526_v40  ;;  %v533_v16 = vshrl.u32 %v1373_v8, %v527_v61  ;;  %v536_v17 = vshrl.u32 %v1374_v10, %v527_v61 }
  0xd3   : > { %v285_v2 = vsel %vm202_vm14, %v284_v9, %v283_v44  ;;  %v469_v50 = vadd.s32 536870912, %v468_v39  ;;  %v383_v46 = vor.u32 4788187, %v382_v11  ;;  %v535_v48 = vshll.u32 %v1373_v8, %v526_v40 }
  0xd4   : > { %v288_v13 = vsel %vm1561_vm13, %v1462_v30, %v285_v2  ;;  %v538_v54 = vshll.u32 %v1374_v10, %v526_v40  ;;  %v539_v55 = vshrl.u32 %v1375_v12, %v527_v61  ;;  %v386_v21 = vcvt.s32.f32 %v379_v14 }
  0xd5   : > { %1258 = vcosq.f32 %v288_v13  ;;  %v1671_v18 = vshrl.u32 %v469_v50, 30  ;;  %v384_v20 = vand.u32 2147483647, %v383_v46  ;;  %v541_v22 = vshll.u32 %v1375_v12, %v526_v40 }
  0xd6   : > { %1260 = vsinq.f32 %v288_v13  ;;  %v542_v25 = vshrl.u32 %v1376_v19, %v527_v61  ;;  %v531_v28 = vor.u32 %v530_v7, %v529_v59  ;;  %v540_v33 = vor.u32 %v539_v55, %v538_v54 }
  0xd7   : > { %v471_v27 = vshll.u32 %v1671_v18, 30  ;;  %vm296_vm9 = vcmp.eq.s32.totalorder %v1654_v57, 0  ;;  %v387_v34 = vmul.f32 %v386_v21, %v384_v20  ;;  %v534_v36 = vor.u32 %v533_v16, %v532_v15 }
  0xd8   : > { %v537_v29 = vor.u32 %v536_v17, %v535_v48  ;;  %v543_v44 = vor.u32 %v542_v25, %v541_v22  ;;  %vm295_vm10 = vcmp.lt.s32.totalorder %v1654_v57, 2  ;;  %vm299_vm11 = vcmp.eq.s32.totalorder %v1654_v57, 2 }
  0xd9   : > { %v1682_v45 = vand.u32 3, %v397_v3  ;;  %v1684_v40 = vsub.s32 %v468_v39, %v471_v27  ;;  %v1686_v49 = vshll.u32 %v520_v38, 8  ;;  %vm292_vm12 = vweird.f32 %v1462_v30 }
  0xda   : > { %v388_v52 = vxor.u32 2147483648, %v387_v34  ;;  %v528_v53 = vshrl.u32 %v1371_v4, %v527_v61  ;;  %vm544_vm13 = vcmp.lt.s32.totalorder %v1661_v63, 1  ;;  %vm547_vm14 = vcmp.lt.s32.totalorder %v1661_v63, 4 }
  0xdb   : > { %v474_v23 = vsub.s32 0, %v1684_v40  ;;  %v494_v56 = vsub.s32 4, %v1671_v18  ;;  %vm546_vm15 = vcmp.lt.s32.totalorder %v1661_v63, 3  ;;  %v553_v9 = vsel %vm547_vm14, %v540_v33, 920167782 }
  0xdc   : > { %v389_v38 = vsel %vm306_vm1, %v388_v52, %v387_v34  ;;  %v552_v58 = vsel %vm544_vm13, %v531_v28, %v534_v36  ;;  %v554_v61 = vsel %vm546_vm15, %v537_v29, %v553_v9  ;;  %v557_v62 = vsel %vm547_vm14, %v543_v44, 1326507024 }
  0xdd   : > { %v392_v47 = vsel %vm1610_vm5, %v1468_v35, %v389_v38  ;;  %v1131_v51 = vmin.u32 %v474_v23, %v1684_v40  ;;  %v549_v2 = vsel %vm547_vm14, %v537_v29, 2102212464  ;;  %v556_v3 = vsel %vm544_vm13, %v534_v36, %v537_v29 }
  0xde   : > { %1262 = vcosq.f32 %v392_v47  ;;  %vm545_vm0 = vcmp.lt.s32.totalorder %v1661_v63, 2  ;;  %v558_v14 = vsel %vm546_vm15, %v540_v33, %v557_v62  ;;  %v548_v7 = vsel %vm544_vm13, %v528_v53, %v531_v28 }
  0xdf   : > { %v1259_v37 = vpop.eup %1258  ;;  %1264 = vsinq.f32 %v392_v47  ;;  %v476_v5 = vclz %v1131_v51  ;;  %v555_v59 = vsel %vm545_vm0, %v552_v58, %v554_v61  ;;  %v550_v15 = vsel %vm546_vm15, %v534_v36, %v549_v2 }
  0xe0   : > { %v1261_v39 = vpop.eup %1260  ;;  %v300_v13 = vxor.u32 2147483648, %v1259_v37  ;;  %v559_v46 = vsel %vm545_vm0, %v556_v3, %v558_v14  ;;  %v1732_v20 = vmul.u32.u64.low %v1686_v49, %v555_v59  ;;  %v1733_v21 = vmul.u32.u64.high %v1686_v49, %v555_v59, %v1732_v20 }
  0xe1   : > { %v297_v11 = vxor.u32 2147483648, %v1261_v39  ;;  %v1132_v17 = vadd.s32 4294967294, %v476_v5  ;;  %v1726_v48 = vmul.u32.u64.low %v1686_v49, %v559_v46  ;;  %v1727_v54 = vmul.u32.u64.high %v1686_v49, %v559_v46, %v1726_v48 }
  0xe2   : > { %v301_v50 = vsel %vm299_vm11, %v300_v13, %v1261_v39  ;;  %v619_v22 = vand.u32 2139095040, %v1464_v31  ;;  %vm1741_vm1 = vcmp.le.f32.partialorder %v408_v1, 0.7853982  ;;  %vm410_vm2 = vcmp.lt.s32.totalorder %v1472_v41, 0 }
  0xe3   : > { %v298_v16 = vsel %vm296_vm9, %v1259_v37, %v297_v11  ;;  %vm1133_vm3 = vcmp.lt.s32.totalorder %v1132_v17, 0  ;;  %v551_v28 = vsel %vm545_vm0, %v548_v7, %v550_v15  ;;  %v616_v33 = vand.u32 2147483647, %v1464_v31 }
  0xe4   : > { %v302_v55 = vsel %vm295_vm10, %v298_v16, %v301_v50  ;;  %v479_v57 = vsel %vm1133_vm3, 0, %v1132_v17  ;;  %v620_v34 = vshrl.u32 %v619_v22, 23  ;;  %vm396_vm4 = vweird.f32 %v1468_v35 }
  0xe5   : > { %v303_v25 = vsel %vm292_vm12, nan, %v302_v55  ;;  %v464_v30 = vadd.s32 %v1638_v26, %v1635_v24  ;;  %v480_v1 = vsub.s32 32, %v479_v57  ;;  %v484_v36 = vsub.s32 4294967266, %v479_v57 }
  0xe6   : > { %1032 = vst [vmem:[%s1749_s5] sm:$0xff] %v303_v25  ;;  %v495_v29 = vsel %vm410_vm2, %v494_v56, %v1671_v18  ;;  %vm399_vm5 = vcmp.lt.s32.totalorder %v1682_v45, 2  ;;  %vm569_vm6 = vc.u32 %v1727_v54, %v1732_v20  ;;  %v570_v63 = vadd.s32 1, %v1733_v21 }
  0xe7   : > { %v1138_v44 = vadd.s32 4294967169, %v620_v34  ;;  %v481_v52 = vshll.u32 %v1684_v40, %v479_v57  ;;  %v482_v53 = vshrl.u32 %v464_v30, %v480_v1  ;;  %v485_v23 = vadd.s32 127, %v484_v36 }
  0xe8   : > { %v567_v24 = vmul.u32 %v1686_v49, %v551_v28  ;;  %v1263_v26 = vpop.eup %1262  ;;  %v497_v9 = vsel %vm1741_vm1, 0, %v495_v29  ;;  %v571_v18 = vsel %vm569_vm6, %v570_v63, %v1733_v21  ;;  %v723_v38 = vand.u32 2139095040, %v1466_v32 }
  0xe9   : > { %v626_v56 = vadd.s32 1, %v1138_v44  ;;  %v1265_v58 = vpop.eup %1264  ;;  %v404_v61 = vxor.u32 2147483648, %v1263_v26  ;;  %v483_v62 = vor.u32 %v482_v53, %v481_v52  ;;  %v486_v37 = vshll.u32 %v485_v23, 23 }
  0xea   : > { %v572_v47 = vadd.s32 %v571_v18, %v567_v24  ;;  %vm400_vm7 = vcmp.eq.s32.totalorder %v1682_v45, 0  ;;  %v401_v40 = vxor.u32 2147483648, %v1265_v58  ;;  %vm403_vm8 = vcmp.eq.s32.totalorder %v1682_v45, 2 }
  0xeb   : > { %vm627_vm9 = vcmp.gt.s32.totalorder %v626_v56, 0  ;;  %v405_v49 = vsel %vm403_vm8, %v404_v61, %v1265_v58  ;;  %v487_v51 = vor.u32 4788187, %v486_v37  ;;  %v501_v2 = vadd.s32 3, %v497_v9 }
  0xec   : > { %v573_v3 = vadd.s32 536870912, %v572_v47  ;;  %v402_v39 = vsel %vm400_vm7, %v1263_v26, %v401_v40  ;;  %v623_v13 = vand.u32 8388607, %v616_v33  ;;  %v628_v14 = vsel %vm627_vm9, %v626_v56, 0 }
  0xed   : > { %v724_v11 = vshrl.u32 %v723_v38, 23  ;;  %v406_v5 = vsel %vm399_vm5, %v402_v39, %v405_v49  ;;  %v488_v59 = vand.u32 2147483647, %v487_v51  ;;  %v490_v50 = vcvt.s32.f32 %v483_v62 }
  0xee   : > { %v1774_v7 = vshrl.u32 %v573_v3, 30  ;;  %v407_v15 = vsel %vm396_vm4, nan, %v406_v5  ;;  %v630_v46 = vand.u32 31, %v628_v14  ;;  %v1780_v48 = vand.u32 3, %v501_v2 }
  0xef   : > { %v491_v16 = vmul.f32 %v490_v50, %v488_v59  ;;  %1033 = vst [vmem:[%s1749_s5 + $0x8] sm:$0xff] %v407_v15  ;;  %v624_v55 = vor.u32 8388608, %v623_v13  ;;  %v720_v22 = vand.u32 2147483647, %v1466_v32  ;;  %v1785_v57 = vshrl.u32 %v628_v14, 5 }
  0xf0   : > { %v575_v17 = vshll.u32 %v1774_v7, 30  ;;  %v631_v21 = vsub.s32 32, %v630_v46  ;;  %v1142_v28 = vadd.s32 4294967169, %v724_v11  ;;  %v633_v35 = vshll.u32 %v1371_v4, %v630_v46 }
  0xf1   : > { %v492_v45 = vxor.u32 2147483648, %v491_v16  ;;  %v636_v30 = vshll.u32 %v1372_v6, %v630_v46  ;;  %v639_v63 = vshll.u32 %v1373_v8, %v630_v46  ;;  %v642_v23 = vshll.u32 %v1374_v10, %v630_v46 }
  0xf2   : > { %v1783_v25 = vsub.s32 %v572_v47, %v575_v17  ;;  %v634_v34 = vshrl.u32 %v1372_v6, %v631_v21  ;;  %v637_v1 = vshrl.u32 %v1373_v8, %v631_v21  ;;  %v640_v44 = vshrl.u32 %v1374_v10, %v631_v21 }
  0xf3   : > { %v493_v36 = vsel %vm410_vm2, %v492_v45, %v491_v16  ;;  %v643_v24 = vshrl.u32 %v1375_v12, %v631_v21  ;;  %v645_v38 = vshll.u32 %v1375_v12, %v630_v46  ;;  %v646_v58 = vshrl.u32 %v1376_v19, %v631_v21 }
  0xf4   : > { %v578_v29 = vsub.s32 0, %v1783_v25  ;;  %v496_v52 = vsel %vm1741_vm1, %v1472_v41, %v493_v36  ;;  %v635_v53 = vor.u32 %v634_v34, %v633_v35  ;;  %v638_v9 = vor.u32 %v637_v1, %v636_v30 }
  0xf5   : > { %1266 = vcosq.f32 %v496_v52  ;;  %v641_v18 = vor.u32 %v640_v44, %v639_v63  ;;  %v644_v56 = vor.u32 %v643_v24, %v642_v23  ;;  %v568_v27 = vadd.s32 %v1732_v20, %v1727_v54 }
  0xf6   : > { %v1135_v26 = vmin.u32 %v578_v29, %v1783_v25  ;;  %1268 = vsinq.f32 %v496_v52  ;;  %v1806_v62 = vshll.u32 %v624_v55, 8  ;;  %v730_v37 = vadd.s32 1, %v1142_v28 }
  0xf7   : > { %vm514_vm10 = vcmp.lt.s32.totalorder %v1485_v60, 0  ;;  %v598_v47 = vsub.s32 4, %v1774_v7  ;;  %v632_v40 = vshrl.u32 %v1371_v4, %v631_v21  ;;  %v647_v49 = vor.u32 %v646_v58, %v645_v38 }
  0xf8   : > { %v580_v61 = vclz %v1135_v26  ;;  %vm648_vm11 = vcmp.lt.s32.totalorder %v1785_v57, 1  ;;  %vm507_vm12 = vcmp.eq.s32.totalorder %v1780_v48, 2  ;;  %vm650_vm13 = vcmp.lt.s32.totalorder %v1785_v57, 3 }
  0xf9   : > { %vm651_vm14 = vcmp.lt.s32.totalorder %v1785_v57, 4  ;;  %v656_v54 = vsel %vm648_vm11, %v635_v53, %v638_v9  ;;  %v660_v3 = vsel %vm648_vm11, %v638_v9, %v641_v18  ;;  %vm503_vm15 = vcmp.lt.s32.totalorder %v1780_v48, 2 }
  0xfa   : > { %v1136_v51 = vadd.s32 4294967294, %v580_v61  ;;  %v653_v20 = vsel %vm651_vm14, %v641_v18, 2102212464  ;;  %v657_v2 = vsel %vm651_vm14, %v644_v56, 920167782  ;;  %vm649_vm2 = vcmp.lt.s32.totalorder %v1785_v57, 2 }
  0xfb   : > { %v661_v39 = vsel %vm651_vm14, %v647_v49, 1326507024  ;;  %vm1822_vm0 = vcmp.le.f32.partialorder %v512_v0, 0.7853982  ;;  %v658_v14 = vsel %vm650_vm13, %v641_v18, %v657_v2  ;;  %vm500_vm3 = vweird.f32 %v1472_v41 }
  0xfc   : > { %vm1137_vm1 = vcmp.lt.s32.totalorder %v1136_v51, 0  ;;  %v662_v11 = vsel %vm650_vm13, %v644_v56, %v661_v39  ;;  %v652_v59 = vsel %vm648_vm11, %v632_v40, %v635_v53  ;;  %v659_v0 = vsel %vm649_vm2, %v656_v54, %v658_v14 }
  0xfd   : > { %v583_v5 = vsel %vm1137_vm1, 0, %v1136_v51  ;;  %v663_v50 = vsel %vm649_vm2, %v660_v3, %v662_v11  ;;  %v654_v16 = vsel %vm650_vm13, %v638_v9, %v653_v20  ;;  %vm731_vm4 = vcmp.gt.s32.totalorder %v730_v37, 0 }
  0xfe   : > { %v584_v15 = vsub.s32 32, %v583_v5  ;;  %v588_v46 = vsub.s32 4294967266, %v583_v5  ;;  %v1841_v17 = vmul.u32.u64.low %v1806_v62, %v663_v50  ;;  %v1842_v55 = vmul.u32.u64.high %v1806_v62, %v663_v50, %v1841_v17 }
  0xff   : > { %v1845_v21 = vmul.u32.u64.low %v1806_v62, %v659_v0  ;;  %v1846_v45 = vmul.u32.u64.high %v1806_v62, %v659_v0, %v1845_v21  ;;  %v1267_v28 = vpop.eup %1266  ;;  %v585_v35 = vshll.u32 %v1783_v25, %v583_v5  ;;  %v732_v1 = vsel %vm731_vm4, %v730_v37, 0 }
 0x100   : > { %v586_v34 = vshrl.u32 %v568_v27, %v584_v15  ;;  %v589_v30 = vadd.s32 127, %v588_v46  ;;  %v1269_v36 = vpop.eup %1268  ;;  %v508_v29 = vxor.u32 2147483648, %v1267_v28  ;;  %v655_v63 = vsel %vm649_vm2, %v652_v59, %v654_v16 }
 0x101   : > { %v727_v44 = vand.u32 8388607, %v720_v22  ;;  %v734_v52 = vand.u32 31, %v732_v1  ;;  %v505_v53 = vxor.u32 2147483648, %v1269_v36  ;;  %v599_v26 = vsel %vm514_vm10, %v598_v47, %v1774_v7 }
 0x102   : > { %v587_v23 = vor.u32 %v586_v34, %v585_v35  ;;  %v590_v24 = vshll.u32 %v589_v30, 23  ;;  %vm504_vm5 = vcmp.eq.s32.totalorder %v1780_v48, 0  ;;  %v509_v25 = vsel %vm507_vm12, %v508_v29, %v1269_v36 }
 0x103   : > { %vm673_vm6 = vc.u32 %v1842_v55, %v1845_v21  ;;  %v674_v57 = vadd.s32 1, %v1846_v45  ;;  %v506_v9 = vsel %vm504_vm5, %v1267_v28, %v505_v53  ;;  %v671_v56 = vmul.u32 %v1806_v62, %v655_v63 }
 0x104   : > { %v591_v18 = vor.u32 4788187, %v590_v24  ;;  %v735_v38 = vsub.s32 32, %v734_v52  ;;  %v510_v58 = vsel %vm503_vm15, %v506_v9, %v509_v25  ;;  %v601_v7 = vsel %vm1822_vm0, 0, %v599_v26 }
 0x105   : > { %v675_v27 = vsel %vm673_vm6, %v674_v57, %v1846_v45  ;;  %v728_v61 = vor.u32 8388608, %v727_v44  ;;  %v511_v37 = vsel %vm500_vm3, nan, %v510_v58  ;;  %v594_v40 = vcvt.s32.f32 %v587_v23 }
 0x106   : > { %v592_v47 = vand.u32 2147483647, %v591_v18  ;;  %v676_v49 = vadd.s32 %v675_v27, %v671_v56  ;;  %v737_v51 = vshll.u32 %v1371_v4, %v734_v52  ;;  %v738_v62 = vshrl.u32 %v1372_v6, %v735_v38  ;;  %1034 = vst [vmem:[%s1749_s5 + $0x10] sm:$0xff] %v511_v37 }
 0x107   : > { %v741_v54 = vshrl.u32 %v1373_v8, %v735_v38  ;;  %v744_v48 = vshrl.u32 %v1374_v10, %v735_v38  ;;  %v740_v3 = vshll.u32 %v1372_v6, %v734_v52  ;;  %v747_v39 = vshrl.u32 %v1375_v12, %v735_v38 }
 0x108   : > { %v595_v20 = vmul.f32 %v594_v40, %v592_v47  ;;  %v677_v2 = vadd.s32 536870912, %v676_v49  ;;  %v733_v41 = vshrl.u32 %v732_v1, 5  ;;  %v739_v14 = vor.u32 %v738_v62, %v737_v51 }
 0x109   : > { %v743_v11 = vshll.u32 %v1373_v8, %v734_v52  ;;  %v746_v5 = vshll.u32 %v1374_v10, %v734_v52  ;;  %v742_v50 = vor.u32 %v741_v54, %v740_v3  ;;  %v750_v15 = vshrl.u32 %v1376_v19, %v735_v38 }
 0x10a   : > { %v596_v59 = vxor.u32 2147483648, %v595_v20  ;;  %v678_v0 = vshrl.u32 %v677_v2, 30  ;;  %vm618_vm7 = vcmp.lt.s32.totalorder %v1464_v31, 0  ;;  %v749_v17 = vshll.u32 %v1375_v12, %v734_v52 }
 0x10b   : > { %v745_v46 = vor.u32 %v744_v48, %v743_v11  ;;  %v748_v16 = vor.u32 %v747_v39, %v746_v5  ;;  %v1883_v45 = vshll.u32 %v728_v61, 8  ;;  %v605_v35 = vadd.s32 3, %v601_v7 }
 0x10c   : > { %v597_v28 = vsel %vm514_vm10, %v596_v59, %v595_v20  ;;  %v679_v34 = vshll.u32 %v678_v0, 30  ;;  %v736_v30 = vshrl.u32 %v1371_v4, %v735_v38  ;;  %v751_v36 = vor.u32 %v750_v15, %v749_v17 }
 0x10d   : > { %v600_v1 = vsel %vm1822_vm0, %v1485_v60, %v597_v28  ;;  %vm752_vm8 = vcmp.lt.s32.totalorder %v733_v41, 1  ;;  %vm753_vm9 = vcmp.lt.s32.totalorder %v733_v41, 2  ;;  %vm755_vm11 = vcmp.lt.s32.totalorder %v733_v41, 4 }
 0x10e   : > { %1270 = vcosq.f32 %v600_v1  ;;  %v1891_v29 = vsub.s32 %v676_v49, %v679_v34  ;;  %v760_v63 = vsel %vm752_vm8, %v739_v14, %v742_v50  ;;  %vm754_vm12 = vcmp.lt.s32.totalorder %v733_v41, 3 }
 0x10f   : > { %1272 = vsinq.f32 %v600_v1  ;;  %v757_v44 = vsel %vm755_vm11, %v745_v46, 2102212464  ;;  %v761_v52 = vsel %vm755_vm11, %v748_v16, 920167782  ;;  %v702_v23 = vsub.s32 4, %v678_v0 }
 0x110   : > { %v682_v53 = vsub.s32 0, %v1891_v29  ;;  %v762_v24 = vsel %vm754_vm12, %v745_v46, %v761_v52  ;;  %v764_v13 = vsel %vm752_vm8, %v742_v50, %v745_v46  ;;  %v606_v26 = vand.u32 3, %v605_v35 }
 0x111   : > { %v763_v25 = vsel %vm753_vm9, %v760_v63, %v762_v24  ;;  %v765_v57 = vsel %vm755_vm11, %v751_v36, 1326507024  ;;  %v827_v9 = vand.u32 2139095040, %v1474_v42  ;;  %v756_v56 = vsel %vm752_vm8, %v736_v30, %v739_v14 }
 0x112   : > { %v1139_v18 = vmin.u32 %v682_v53, %v1891_v29  ;;  %v758_v38 = vsel %vm754_vm12, %v742_v50, %v757_v44  ;;  %v766_v58 = vsel %vm754_vm12, %v748_v16, %v765_v57  ;;  %v703_v40 = vsel %vm618_vm7, %v702_v23, %v678_v0 }
 0x113   : > { %v767_v7 = vsel %vm753_vm9, %v764_v13, %v766_v58  ;;  %v1902_v27 = vmul.u32.u64.low %v1883_v45, %v763_v25  ;;  %v1903_v61 = vmul.u32.u64.high %v1883_v45, %v763_v25, %v1902_v27  ;;  %v828_v37 = vshrl.u32 %v827_v9, 23 }
 0x114   : > { %v684_v47 = vclz %v1139_v18  ;;  %v824_v49 = vand.u32 2147483647, %v1474_v42  ;;  %v759_v51 = vsel %vm753_vm9, %v756_v56, %v758_v38  ;;  %vm604_vm10 = vweird.f32 %v1485_v60 }
 0x115   : > { %v1911_v62 = vmul.u32.u64.low %v1883_v45, %v767_v7  ;;  %v1912_v54 = vmul.u32.u64.high %v1883_v45, %v767_v7, %v1911_v62  ;;  %v1146_v48 = vadd.s32 4294967169, %v828_v37  ;;  %vm607_vm13 = vcmp.lt.s32.totalorder %v606_v26, 2 }
 0x116   : > { %vm1917_vm14 = vcmp.le.f32.partialorder %v616_v33, 0.7853982  ;;  %v1140_v2 = vadd.s32 4294967294, %v684_v47  ;;  %vm608_vm15 = vcmp.eq.s32.totalorder %v606_v26, 0  ;;  %vm611_vm0 = vcmp.eq.s32.totalorder %v606_v26, 2 }
 0x117   : > { %v778_v3 = vadd.s32 1, %v1903_v61  ;;  %v834_v39 = vadd.s32 1, %v1146_v48  ;;  %v672_v14 = vadd.s32 %v1845_v21, %v1842_v55  ;;  %v705_v11 = vsel %vm1917_vm14, 0, %v703_v40 }
 0x118   : > { %v1271_v41 = vpop.eup %1270  ;;  %vm1141_vm1 = vcmp.lt.s32.totalorder %v1140_v2, 0  ;;  %v775_v5 = vmul.u32 %v1883_v45, %v759_v51  ;;  %vm777_vm2 = vc.u32 %v1912_v54, %v1902_v27  ;;  %v831_v50 = vand.u32 8388607, %v824_v49 }
 0x119   : > { %v1273_v33 = vpop.eup %1272  ;;  %v612_v59 = vxor.u32 2147483648, %v1271_v41  ;;  %v687_v0 = vsel %vm1141_vm1, 0, %v1140_v2  ;;  %v931_v55 = vand.u32 2139095040, %v1476_v43  ;;  %v779_v45 = vsel %vm777_vm2, %v778_v3, %v1903_v61 }
 0x11a   : > { %v609_v15 = vxor.u32 2147483648, %v1273_v33  ;;  %v688_v46 = vsub.s32 32, %v687_v0  ;;  %v692_v16 = vsub.s32 4294967266, %v687_v0  ;;  %v689_v17 = vshll.u32 %v1891_v29, %v687_v0 }
 0x11b   : > { %v613_v21 = vsel %vm611_vm0, %v612_v59, %v1273_v33  ;;  %vm835_vm3 = vcmp.gt.s32.totalorder %v834_v39, 0  ;;  %v780_v30 = vadd.s32 %v779_v45, %v775_v5  ;;  %v709_v36 = vadd.s32 3, %v705_v11 }
 0x11c   : > { %v610_v28 = vsel %vm608_vm15, %v1271_v41, %v609_v15  ;;  %v690_v35 = vshrl.u32 %v672_v14, %v688_v46  ;;  %v693_v34 = vadd.s32 127, %v692_v16  ;;  %v832_v63 = vor.u32 8388608, %v831_v50 }
 0x11d   : > { %v614_v1 = vsel %vm607_vm13, %v610_v28, %v613_v21  ;;  %v836_v44 = vsel %vm835_vm3, %v834_v39, 0  ;;  %v781_v29 = vadd.s32 536870912, %v780_v30  ;;  %v932_v13 = vshrl.u32 %v931_v55, 23 }
 0x11e   : > { %v615_v52 = vsel %vm604_vm10, nan, %v614_v1  ;;  %v691_v53 = vor.u32 %v690_v35, %v689_v17  ;;  %v694_v23 = vshll.u32 %v693_v34, 23  ;;  %v838_v24 = vand.u32 31, %v836_v44 }
 0x11f   : > { %1035 = vst [vmem:[%s1749_s5 + $0x18] sm:$0xff] %v615_v52  ;;  %v1940_v57 = vshrl.u32 %v781_v29, 30  ;;  %v1942_v9 = vand.u32 3, %v709_v36  ;;  %v928_v26 = vand.u32 2147483647, %v1476_v43  ;;  %v1946_v60 = vshll.u32 %v832_v63, 8 }
 0x120   : > { %v695_v25 = vor.u32 4788187, %v694_v23  ;;  %v839_v18 = vsub.s32 32, %v838_v24  ;;  %v698_v38 = vcvt.s32.f32 %v691_v53  ;;  %v1150_v47 = vadd.s32 4294967169, %v932_v13 }
 0x121   : > { %v783_v58 = vshll.u32 %v1940_v57, 30  ;;  %v841_v62 = vshll.u32 %v1371_v4, %v838_v24  ;;  %v776_v2 = vadd.s32 %v1902_v27, %v1912_v54  ;;  %v837_v3 = vshrl.u32 %v836_v44, 5 }
 0x122   : > { %v696_v56 = vand.u32 2147483647, %v695_v25  ;;  %v842_v7 = vshrl.u32 %v1372_v6, %v839_v18  ;;  %v845_v61 = vshrl.u32 %v1373_v8, %v839_v18  ;;  %v848_v37 = vshrl.u32 %v1374_v10, %v839_v18 }
 0x123   : > { %v1951_v51 = vsub.s32 %v780_v30, %v783_v58  ;;  %v851_v48 = vshrl.u32 %v1375_v12, %v839_v18  ;;  %v844_v39 = vshll.u32 %v1372_v6, %v838_v24  ;;  %v847_v41 = vshll.u32 %v1373_v8, %v838_v24 }
 0x124   : > { %v699_v40 = vmul.f32 %v698_v38, %v696_v56  ;;  %v843_v5 = vor.u32 %v842_v7, %v841_v62  ;;  %v850_v33 = vshll.u32 %v1374_v10, %v838_v24  ;;  %v853_v50 = vshll.u32 %v1375_v12, %v838_v24 }
 0x125   : > { %v786_v11 = vsub.s32 0, %v1951_v51  ;;  %v846_v59 = vor.u32 %v845_v61, %v844_v39  ;;  %v849_v0 = vor.u32 %v848_v37, %v847_v41  ;;  %v854_v15 = vshrl.u32 %v1376_v19, %v839_v18 }
 0x126   : > { %v700_v14 = vxor.u32 2147483648, %v699_v40  ;;  %v852_v46 = vor.u32 %v851_v48, %v850_v33  ;;  %v938_v16 = vadd.s32 1, %v1150_v47  ;;  %v840_v21 = vshrl.u32 %v1371_v4, %v839_v18 }
 0x127   : > { %v1143_v54 = vmin.u32 %v786_v11, %v1951_v51  ;;  %v855_v17 = vor.u32 %v854_v15, %v853_v50  ;;  %vm856_vm4 = vcmp.lt.s32.totalorder %v837_v3, 1  ;;  %vm722_vm5 = vcmp.lt.s32.totalorder %v1466_v32, 0 }
 0x128   : > { %v701_v27 = vsel %vm618_vm7, %v700_v14, %v699_v40  ;;  %vm857_vm6 = vcmp.lt.s32.totalorder %v837_v3, 2  ;;  %vm859_vm8 = vcmp.lt.s32.totalorder %v837_v3, 4  ;;  %vm858_vm7 = vcmp.lt.s32.totalorder %v837_v3, 3 }
 0x129   : > { %v704_v55 = vsel %vm1917_vm14, %v1464_v31, %v701_v27  ;;  %v788_v45 = vclz %v1143_v54  ;;  %v861_v28 = vsel %vm859_vm8, %v849_v0, 2102212464  ;;  %v864_v35 = vsel %vm856_vm4, %v843_v5, %v846_v59 }
 0x12a   : > { %1274 = vcosq.f32 %v704_v55  ;;  %v860_v30 = vsel %vm856_vm4, %v840_v21, %v843_v5  ;;  %v865_v1 = vsel %vm859_vm8, %v852_v46, 920167782  ;;  %v868_v36 = vsel %vm856_vm4, %v846_v59, %v849_v0 }
 0x12b   : > { %1276 = vsinq.f32 %v704_v55  ;;  %v1144_v34 = vadd.s32 4294967294, %v788_v45  ;;  %v862_v20 = vsel %vm858_vm7, %v846_v59, %v861_v28  ;;  %v866_v63 = vsel %vm858_vm7, %v849_v0, %v865_v1 }
 0x12c   : > { %v869_v44 = vsel %vm859_vm8, %v855_v17, 1326507024  ;;  %vm939_vm9 = vcmp.gt.s32.totalorder %v938_v16, 0  ;;  %v806_v52 = vsub.s32 4, %v1940_v57  ;;  %v867_v53 = vsel %vm857_vm6, %v864_v35, %v866_v63 }
 0x12d   : > { %vm1145_vm11 = vcmp.lt.s32.totalorder %v1144_v34, 0  ;;  %v870_v23 = vsel %vm858_vm7, %v852_v46, %v869_v44  ;;  %vm712_vm12 = vcmp.eq.s32.totalorder %v1942_v9, 0  ;;  %vm711_vm10 = vcmp.lt.s32.totalorder %v1942_v9, 2 }
 0x12e   : > { %v791_v29 = vsel %vm1145_vm11, 0, %v1144_v34  ;;  %v871_v24 = vsel %vm857_vm6, %v868_v36, %v870_v23  ;;  %v1976_v13 = vmul.u32.u64.low %v1946_v60, %v867_v53  ;;  %v1977_v25 = vmul.u32.u64.high %v1946_v60, %v867_v53, %v1976_v13 }
 0x12f   : > { %v792_v18 = vsub.s32 32, %v791_v29  ;;  %v796_v56 = vsub.s32 4294967266, %v791_v29  ;;  %v863_v38 = vsel %vm857_vm6, %v860_v30, %v862_v20  ;;  %v940_v58 = vsel %vm939_vm9, %v938_v16, 0 }
 0x130   : > { %vm708_vm13 = vweird.f32 %v1464_v31  ;;  %vm715_vm14 = vcmp.eq.s32.totalorder %v1942_v9, 2  ;;  %v1985_v7 = vmul.u32.u64.low %v1946_v60, %v871_v24  ;;  %v1986_v61 = vmul.u32.u64.high %v1946_v60, %v871_v24, %v1985_v7 }
 0x131   : > { %v942_v37 = vand.u32 31, %v940_v58  ;;  %v793_v47 = vshll.u32 %v1951_v51, %v791_v29  ;;  %v794_v40 = vshrl.u32 %v776_v2, %v792_v18  ;;  %v797_v62 = vadd.s32 127, %v796_v56 }
 0x132   : > { %v935_v48 = vand.u32 8388607, %v928_v26  ;;  %v807_v3 = vsel %vm722_vm5, %v806_v52, %v1940_v57  ;;  %v879_v39 = vmul.u32 %v1946_v60, %v863_v38  ;;  %v882_v41 = vadd.s32 1, %v1977_v25 }
 0x133   : > { %v1996_v14 = vsub.s32 32, %v942_v37  ;;  %v795_v5 = vor.u32 %v794_v40, %v793_v47  ;;  %v798_v33 = vshll.u32 %v797_v62, 23  ;;  %v1998_v59 = vshrl.u32 %v940_v58, 5 }
 0x134   : > { %v1275_v11 = vpop.eup %1274  ;;  %v945_v51 = vshll.u32 %v1371_v4, %v942_v37  ;;  %vm881_vm15 = vc.u32 %v1986_v61, %v1976_v13  ;;  %v948_v57 = vshll.u32 %v1372_v6, %v942_v37  ;;  %v954_v60 = vshll.u32 %v1374_v10, %v942_v37 }
 0x135   : > { %v1277_v2 = vpop.eup %1276  ;;  %v716_v0 = vxor.u32 2147483648, %v1275_v11  ;;  %v799_v15 = vor.u32 4788187, %v798_v33  ;;  %v802_v27 = vcvt.s32.f32 %v795_v5  ;;  %v883_v54 = vsel %vm881_vm15, %v882_v41, %v1977_v25 }
 0x136   : > { %v713_v50 = vxor.u32 2147483648, %v1277_v2  ;;  %v884_v16 = vadd.s32 %v883_v54, %v879_v39  ;;  %v946_v55 = vshrl.u32 %v1372_v6, %v1996_v14  ;;  %v949_v21 = vshrl.u32 %v1373_v8, %v1996_v14 }
 0x137   : > { %v717_v46 = vsel %vm715_vm14, %v716_v0, %v1277_v2  ;;  %v800_v45 = vand.u32 2147483647, %v799_v15  ;;  %v952_v28 = vshrl.u32 %v1374_v10, %v1996_v14  ;;  %v955_v35 = vshrl.u32 %v1375_v12, %v1996_v14 }
 0x138   : > { %v714_v17 = vsel %vm712_vm12, %v1275_v11, %v713_v50  ;;  %v885_v30 = vadd.s32 536870912, %v884_v16  ;;  %v947_v1 = vor.u32 %v946_v55, %v945_v51  ;;  %v951_v6 = vshll.u32 %v1373_v8, %v942_v37 }
 0x139   : > { %v718_v34 = vsel %vm711_vm10, %v714_v17, %v717_v46  ;;  %v803_v20 = vmul.f32 %v802_v27, %v800_v45  ;;  %v950_v63 = vor.u32 %v949_v21, %v948_v57  ;;  %v956_v44 = vor.u32 %v955_v35, %v954_v60 }
 0x13a   : > { %v719_v36 = vsel %vm708_vm13, nan, %v718_v34  ;;  %v2023_v52 = vshrl.u32 %v885_v30, 30  ;;  %v936_v53 = vor.u32 8388608, %v935_v48  ;;  %v958_v10 = vshrl.u32 %v1376_v19, %v1996_v14 }
 0x13b   : > { %1036 = vst [vmem:[%s1749_s5 + $0x20] sm:$0xff] %v719_v36  ;;  %vm2030_vm0 = vcmp.le.f32.partialorder %v720_v22, 0.7853982  ;;  %v804_v8 = vxor.u32 2147483648, %v803_v20  ;;  %v953_v23 = vor.u32 %v952_v28, %v951_v6  ;;  %v957_v31 = vshll.u32 %v1375_v12, %v942_v37 }
 0x13c   : > { %v809_v29 = vsel %vm2030_vm0, 0, %v807_v3  ;;  %v887_v24 = vshll.u32 %v2023_v52, 30  ;;  %vm960_vm1 = vcmp.lt.s32.totalorder %v1998_v59, 1  ;;  %vm963_vm2 = vcmp.lt.s32.totalorder %v1998_v59, 4 }
 0x13d   : > { %v805_v19 = vsel %vm722_vm5, %v804_v8, %v803_v20  ;;  %v959_v22 = vor.u32 %v958_v10, %v957_v31  ;;  %v968_v25 = vsel %vm960_vm1, %v947_v1, %v950_v63  ;;  %v969_v18 = vsel %vm963_vm2, %v956_v44, 920167782 }
 0x13e   : > { %v808_v12 = vsel %vm2030_vm0, %v1466_v32, %v805_v19  ;;  %v888_v56 = vsub.s32 %v884_v16, %v887_v24  ;;  %vm962_vm3 = vcmp.lt.s32.totalorder %v1998_v59, 3  ;;  %v976_v38 = vshll.u32 %v936_v53, 8 }
 0x13f   : > { %1278 = vcosq.f32 %v808_v12  ;;  %v813_v58 = vadd.s32 3, %v809_v29  ;;  %vm961_vm4 = vcmp.lt.s32.totalorder %v1998_v59, 2  ;;  %v970_v7 = vsel %vm962_vm3, %v953_v23, %v969_v18 }
 0x140   : > { %1280 = vsinq.f32 %v808_v12  ;;  %v890_v37 = vsub.s32 0, %v888_v56  ;;  %v965_v47 = vsel %vm963_vm2, %v953_v23, 2102212464  ;;  %v971_v40 = vsel %vm961_vm4, %v968_v25, %v970_v7 }
 0x141   : > { %v972_v62 = vsel %vm960_vm1, %v950_v63, %v953_v23  ;;  %v973_v48 = vsel %vm963_vm2, %v959_v22, 1326507024  ;;  %v2061_v3 = vmul.u32.u64.low %v976_v38, %v971_v40  ;;  %v2062_v39 = vmul.u32.u64.high %v976_v38, %v971_v40, %v2061_v3 }
 0x142   : > { %v1147_v41 = vmin.u32 %v890_v37, %v888_v56  ;;  %v944_v11 = vshrl.u32 %v1371_v4, %v1996_v14  ;;  %v974_v5 = vsel %vm962_vm3, %v956_v44, %v973_v48  ;;  %v966_v0 = vsel %vm962_vm3, %v950_v63, %v965_v47 }
 0x143   : > { %v975_v33 = vsel %vm961_vm4, %v972_v62, %v974_v5  ;;  %v814_v57 = vand.u32 3, %v813_v58  ;;  %v986_v14 = vadd.s32 1, %v2062_v39  ;;  %v880_v54 = vadd.s32 %v1976_v13, %v1986_v61 }
 0x144   : > { %v892_v51 = vclz %v1147_v41  ;;  %v964_v2 = vsel %vm960_vm1, %v944_v11, %v947_v1  ;;  %v2075_v60 = vmul.u32.u64.low %v976_v38, %v975_v33  ;;  %v2076_v50 = vmul.u32.u64.high %v976_v38, %v975_v33, %v2075_v60 }
 0x145   : > { %v967_v4 = vsel %vm961_vm4, %v964_v2, %v966_v0  ;;  %vm816_vm6 = vcmp.eq.s32.totalorder %v814_v57, 0  ;;  %vm819_vm7 = vcmp.eq.s32.totalorder %v814_v57, 2  ;;  %vm812_vm9 = vweird.f32 %v1466_v32 }
 0x146   : > { %v1148_v15 = vadd.s32 4294967294, %v892_v51  ;;  %vm985_vm8 = vc.u32 %v2076_v50, %v2061_v3  ;;  %v983_v45 = vmul.u32 %v976_v38, %v967_v4  ;;  %vm815_vm11 = vcmp.lt.s32.totalorder %v814_v57, 2 }
 0x147   : > { %v987_v35 = vsel %vm985_vm8, %v986_v14, %v2062_v39  ;;  %v910_v29 = vsub.s32 4, %v2023_v52  ;;  %vm826_vm12 = vcmp.lt.s32.totalorder %v1474_v42, 0  ;;  %vm825_vm10 = vcmp.le.f32.partialorder %v824_v49, 0.7853982 }
 0x148   : > { %vm1149_vm5 = vcmp.lt.s32.totalorder %v1148_v15, 0  ;;  %v988_v6 = vadd.s32 %v987_v35, %v983_v45  ;;  %v984_v47 = vadd.s32 %v2061_v3, %v2076_v50  ;;  %vm916_vm1 = vweird.f32 %v1474_v42 }
 0x149   : > { %v1279_v27 = vpop.eup %1278  ;;  %v895_v46 = vsel %vm1149_vm5, 0, %v1148_v15  ;;  %v911_v25 = vsel %vm826_vm12, %v910_v29, %v2023_v52  ;;  %vm930_vm2 = vcmp.lt.s32.totalorder %v1476_v43, 0  ;;  %vm929_vm3 = vcmp.le.f32.partialorder %v928_v26, 0.7853982 }
 0x14a   : > { %v1281_v16 = vpop.eup %1280  ;;  %v820_v55 = vxor.u32 2147483648, %v1279_v27  ;;  %v896_v21 = vsub.s32 32, %v895_v46  ;;  %v900_v17 = vsub.s32 4294967266, %v895_v46  ;;  %v897_v59 = vshll.u32 %v888_v56, %v895_v46 }
 0x14b   : > { %v817_v28 = vxor.u32 2147483648, %v1281_v16  ;;  %v989_v63 = vadd.s32 536870912, %v988_v6  ;;  %v913_v38 = vsel %vm825_vm10, 0, %v911_v25  ;;  %vm1020_vm8 = vweird.f32 %v1476_v43 }
 0x14c   : > { %v821_v34 = vsel %vm819_vm7, %v820_v55, %v1281_v16  ;;  %v898_v30 = vshrl.u32 %v880_v54, %v896_v21  ;;  %v901_v1 = vadd.s32 127, %v900_v17  ;;  %v917_v7 = vadd.s32 3, %v913_v38 }
 0x14d   : > { %v818_v13 = vsel %vm816_vm6, %v1279_v27, %v817_v28  ;;  %v990_v10 = vshrl.u32 %v989_v63, 30 }
 0x14e   : > { %v822_v61 = vsel %vm815_vm11, %v818_v13, %v821_v34  ;;  %v899_v36 = vor.u32 %v898_v30, %v897_v59  ;;  %v902_v20 = vshll.u32 %v901_v1, 23  ;;  %v918_v49 = vand.u32 3, %v917_v7 }
 0x14f   : > { %v823_v44 = vsel %vm812_vm9, nan, %v822_v61  ;;  %v991_v23 = vshll.u32 %v990_v10, 30  ;;  %v1014_v27 = vsub.s32 4, %v990_v10 }
 0x150   : > { %v903_v53 = vor.u32 4788187, %v902_v20  ;;  %1037 = vst [vmem:[%s1749_s5 + $0x28] sm:$0xff] %v823_v44  ;;  %v906_v8 = vcvt.s32.f32 %v899_v36  ;;  %vm923_vm14 = vcmp.eq.s32.totalorder %v918_v49, 2  ;;  %vm920_vm15 = vcmp.eq.s32.totalorder %v918_v49, 0 }
 0x151   : > { %v992_v24 = vsub.s32 %v988_v6, %v991_v23  ;;  %vm919_vm0 = vcmp.lt.s32.totalorder %v918_v49, 2  ;;  %v1015_v16 = vsel %vm930_vm2, %v1014_v27, %v990_v10 }
 0x152   : > { %v904_v9 = vand.u32 2147483647, %v903_v53  ;;  %v1017_v21 = vsel %vm929_vm3, 0, %v1015_v16 }
 0x153   : > { %v994_v32 = vsub.s32 0, %v992_v24 }
 0x154   : > { %v907_v31 = vmul.f32 %v906_v8, %v904_v9 }
 0x155   : > { %v1151_v18 = vmin.u32 %v994_v32, %v992_v24 }
 0x156   : > { %v908_v19 = vxor.u32 2147483648, %v907_v31 }
 0x157   : > { %v996_v56 = vclz %v1151_v18 }
 0x158   : > { %v909_v22 = vsel %vm826_vm12, %v908_v19, %v907_v31 }
 0x159   : > { %v912_v12 = vsel %vm825_vm10, %v1474_v42, %v909_v22  ;;  %v1152_v58 = vadd.s32 4294967294, %v996_v56  ;;  %v1021_v42 = vadd.s32 3, %v1017_v21 }
 0x15a   : > { %1282 = vcosq.f32 %v912_v12 }
 0x15b   : > { %1284 = vsinq.f32 %v912_v12  ;;  %vm1153_vm13 = vcmp.lt.s32.totalorder %v1152_v58, 0  ;;  %v1022_v17 = vand.u32 3, %v1021_v42 }
 0x15c   : > { %v999_v37 = vsel %vm1153_vm13, 0, %v1152_v58 }
 0x15d   : > { %v1000_v40 = vsub.s32 32, %v999_v37  ;;  %v1004_v62 = vsub.s32 4294967266, %v999_v37  ;;  %v1001_v48 = vshll.u32 %v992_v24, %v999_v37  ;;  %vm1027_vm4 = vcmp.eq.s32.totalorder %v1022_v17, 2 }
 0x15e   : > { %vm1024_vm5 = vcmp.eq.s32.totalorder %v1022_v17, 0  ;;  %vm1023_vm6 = vcmp.lt.s32.totalorder %v1022_v17, 2 }
 0x15f   : > { %v1002_v39 = vshrl.u32 %v984_v47, %v1000_v40  ;;  %v1005_v52 = vadd.s32 127, %v1004_v62 }
 0x161   : > { %v1003_v11 = vor.u32 %v1002_v39, %v1001_v48  ;;  %v1006_v5 = vshll.u32 %v1005_v52, 23 }
 0x163   : > { %v1007_v0 = vor.u32 4788187, %v1006_v5  ;;  %v1010_v50 = vcvt.s32.f32 %v1003_v11 }
 0x164   : > { %v1283_v41 = vpop.eup %1282 }
 0x165   : > { %v1285_v33 = vpop.eup %1284  ;;  %v924_v51 = vxor.u32 2147483648, %v1283_v41  ;;  %v1008_v3 = vand.u32 2147483647, %v1007_v0 }
 0x166   : > { %v921_v2 = vxor.u32 2147483648, %v1285_v33 }
 0x167   : > { %v925_v57 = vsel %vm923_vm14, %v924_v51, %v1285_v33  ;;  %v1011_v14 = vmul.f32 %v1010_v50, %v1008_v3 }
 0x168   : > { %v922_v60 = vsel %vm920_vm15, %v1283_v41, %v921_v2 }
 0x169   : > { %v926_v15 = vsel %vm919_vm0, %v922_v60, %v925_v57  ;;  %v1012_v54 = vxor.u32 2147483648, %v1011_v14 }
 0x16a   : > { %v927_v4 = vsel %vm916_vm1, nan, %v926_v15 }
 0x16b   : > { %1038 = vst [vmem:[%s1749_s5 + $0x30] sm:$0xff] %v927_v4  ;;  %v1013_v46 = vsel %vm930_vm2, %v1012_v54, %v1011_v14 }
 0x16c   : > { %v1016_v55 = vsel %vm929_vm3, %v1476_v43, %v1013_v46 }
 0x16d   : > { %1286 = vcosq.f32 %v1016_v55 }
 0x16e   : > { %1288 = vsinq.f32 %v1016_v55 }
 0x177   : > { %v1287_v45 = vpop.eup %1286 }
 0x178   : > { %v1289_v28 = vpop.eup %1288  ;;  %v1028_v59 = vxor.u32 2147483648, %v1287_v45 }
 0x179   : > { %v1025_v35 = vxor.u32 2147483648, %v1289_v28 }
 0x17a   : > { %v1029_v26 = vsel %vm1027_vm4, %v1028_v59, %v1289_v28 }
 0x17b   : > { %v1026_v34 = vsel %vm1024_vm5, %v1287_v45, %v1025_v35 }
 0x17c   : > { %v1030_v30 = vsel %vm1023_vm6, %v1026_v34, %v1029_v26 }
 0x17d   : > { %v1031_v1 = vsel %vm1020_vm8, nan, %v1030_v30 }
 0x17e   : > { %1039 = vst [vmem:[%s1749_s5 + $0x38] sm:$0xff] %v1031_v1 }
 0x17f   : > { %1303 = shalt.err (!%p1300_p3)
}
 0x180   : > { %s1304_s25 = scalar_lea.hbm %s2108_s16, 1024  ;;  %s1308_s28 = scalar_lea.hbm %s2164_s2, 2048 }
 0x181   : > { %p1305_p5 = scmp.ne.s32.totalorder %s2108_s16, %s1304_s25  ;;  %p1309_p9 = scmp.lt.u32.totalorder %s2108_s16, %s2164_s2 }
 0x182   : > { %p1310_p10 = scmp.lt.u32.totalorder %s1308_s28, %s1304_s25  ;;  %p1312_p12 = scmp.lt.u32.totalorder %s1304_s25, %s2108_s16 }
 0x183   : > { %p1306_p6 = pnand %p1305_p5, %p1435_p4 }
 0x184   : > { %p1311_p11 = por %p1310_p10, %p1309_p9 }
 0x185   : > { %p1307_p7 = pneg %p1306_p6 }
 0x186   : > { %p1313_p13 = por %p1312_p12, %p1311_p11 }
 0x188   : > { %p1314_p0 = pnand %p1313_p13, %p1307_p7 }
 0x18a   : > { %1317 = shalt.err (!%p1314_p0)
}
 0x18b   : > { %s1378_s3 = smov 256   ;;  %s1379_s4 = smov 16  }
 0x18c   : > { %1192 = dma.vmem_to_hbm [thread:$0]  (%p1435_p4), %s2110_s7, 1024, %s2108_s16, %s2116_s12, %s1378_s3, %s1378_s3, %s1379_s4  }
 0x18d PF: > { %p1198_p1 = scmp.ge.s32.totalorder %s1368_s14, 2  ;;  %s1071_s5 = sand.u32 1, %s1348_s9  }
 0x18e   : > { %s1072_s6 = scalar_lea.sflag [#allocation3], %s1071_s5 }
 0x18f   : > { %p1195_p2 = pnand %p1198_p1, %p1442_p8 }
 0x191   : > { %1343 = dma.done.wait (!%p1195_p2), %s1072_s6, 1024  }
 0x192   : > { %1345 = vsyncadd (!%p1195_p2), %s1072_s6, 4294966272  ;;  %s15_s14 = sadd.s32 1, %s1368_s14   ;;  %s2179_s9 = smov %s1352_s10 }
 0x193   : > { %p12_p3 = scmp.ge.s32.totalorder %s15_s14, 4   ;;  %s2180_s10 = smov %s1356_s11 }
 0x194   : > { %s2181_s11 = smov %s1448_s22  ;;  %s2182_s12 = smov %s1364_s13 }
 0x195   : > { %s2183_s13 = smov %s2185_s17  ;;  %14 = sbr.rel (!%p12_p3) target bundleno = 4 (0x4), region = 60 }
 0x19c   :  { %1077 = vsyncpa [#allocation3], 1 }
 0x19d   :  { %1079 = vsyncpa [#allocation3 + $0x1], 1 }

</bundles_post_ra>
